<compile_context>
chip_gen: v7x
topology: tpu7x:2x2x1
jax: 0.10.0
libtpu: 0.0.40
codegen_flags: <defaults>
</compile_context>

<pallas_src>
import functools

import jax
import jax.numpy as jnp
import numpy as np
from jax.experimental import pallas as pl
from jax.experimental.pallas import tpu as pltpu

_SUBLANE = 8
_LANE = 128


# ---------------------------------------------------------------------------
# Pallas kernel: full forward (LSTM recurrence + folded MLP + softmax) in one
# call.  Everything fits comfortably in VMEM at these sizes, so there is no
# grid: the kernel body runs once over whole-array blocks.
# ---------------------------------------------------------------------------
def _cls_model_kernel(
    x_ref,      # (Np, T, I)   f32  (batch_first, batch padded to 8)
    wih_ref,    # (I, 4H)      f32  (= weight_ih_l0.T)
    whh_ref,    # (H, 4H)      f32  (= weight_hh_l0.T)
    b_ref,      # (1, 4H)      f32  (= bias_ih_l0 + bias_hh_l0)
    wmlp_ref,   # (H, Cp)      f32  folded MLP weight (classes padded to 128)
    bmlp_ref,   # (1, Cp)      f32  folded MLP bias   (padding lanes = -1e30)
    out_ref,    # (Np, Cp)     f32
):
    Np, T, I = x_ref.shape
    H = whh_ref.shape[0]

    whh = whh_ref[...]

    # Hoisted input projection: one (Np*T, I) x (I, 4H) matmul (+ combined
    # bias, broadcast once) covering all timesteps.  The reshapes only
    # collapse/split leading dims (last dim untouched), so they are layout
    # no-ops.
    xproj = (
        jnp.dot(x_ref[...].reshape(Np * T, I), wih_ref[...],
                preferred_element_type=jnp.float32)
        + b_ref[...]
    ).reshape(Np, T, 4 * H)

    # h_0 = c_0 = zeros (matches the torch.zeros initial states in forward()).
    h = jnp.zeros((Np, H), jnp.float32)
    c = jnp.zeros((Np, H), jnp.float32)

    # Fully unrolled recurrence (static T): h/c live in vregs, only h @ W_hh
    # is serial per step.
    for t in range(T):
        gates = xproj[:, t, :] + jnp.dot(h, whh,
                                         preferred_element_type=jnp.float32)
        # PyTorch gate order: input, forget, cell(g), output.
        # One full-vreg sigmoid (i/f/o lanes used; g lanes discarded) +
        # one tanh on the g lanes.
        s = jax.nn.sigmoid(gates)
        i_g = s[:, 0 * H:1 * H]
        f_g = s[:, 1 * H:2 * H]
        o_g = s[:, 3 * H:4 * H]
        g_g = jnp.tanh(gates[:, 2 * H:3 * H])
        c = f_g * c + i_g * g_g
        h = o_g * jnp.tanh(c)

    # MLP head: Linear chain with no activations + identity Dropouts
    # == a single affine map (weights folded in prepare_kernel_params).
    logits = (jnp.dot(h, wmlp_ref[...], preferred_element_type=jnp.float32)
              + bmlp_ref[...])

    # Softmax over the class axis.  Padded class lanes carry a -1e30 bias, so
    # exp() underflows to 0 there and they drop out of the normalization.
    logits = logits - jnp.max(logits, axis=1, keepdims=True)
    e = jnp.exp(logits)
    inv = pl.reciprocal(jnp.sum(e, axis=1, keepdims=True), approx=True)
    out_ref[...] = e * inv


# ---------------------------------------------------------------------------
# Wrapper
# ---------------------------------------------------------------------------
@functools.partial(jax.jit, static_argnames=("num_classes",))
def classification_model_forward(X, kernel_params, num_classes):
    """X: (N, T, input_size) float32 (PyTorch batch_first layout)."""
    N, T, _ = X.shape
    Cp = kernel_params["w_mlp"].shape[1]

    Np = ((N + _SUBLANE - 1) // _SUBLANE) * _SUBLANE   # batch -> sublane multiple
    x_p = jnp.pad(X.astype(jnp.float32), ((0, Np - N), (0, 0), (0, 0)))

    vmem = pl.BlockSpec(memory_space=pltpu.MemorySpace.VMEM)
    inputs = (
        x_p,
        kernel_params["wih_t"], kernel_params["whh_t"], kernel_params["b_lstm"],
        kernel_params["w_mlp"], kernel_params["b_mlp"],
    )

    out = pl.pallas_call(
        _cls_model_kernel,
        out_shape=jax.ShapeDtypeStruct((Np, Cp), jnp.float32),
        in_specs=[vmem] * len(inputs),
        out_specs=vmem,
    )(*inputs)
    return out[:N, :num_classes]


# ---------------------------------------------------------------------------
# Deterministic parameter construction (PyTorch layouts, shapes follow the
# nn.Module __init__) and one-time preprocessing for the kernel.
# ---------------------------------------------------------------------------
def make_params(key, input_size, hidden_size, mlp_units=(256, 128, 64, 11)):
    keys = jax.random.split(key, 4 + 2 * len(mlp_units))
    kH = 1.0 / np.sqrt(hidden_size)

    def u(k, shape, bound):
        return jax.random.uniform(k, shape, jnp.float32, -bound, bound)

    params = {
        # LSTM parameters (PyTorch layout: weight_ih (4H, I), weight_hh (4H, H)).
        "weight_ih": u(keys[0], (4 * hidden_size, input_size), kH),
        "weight_hh": u(keys[1], (4 * hidden_size, hidden_size), kH),
        "bias_ih": u(keys[2], (4 * hidden_size,), kH),
        "bias_hh": u(keys[3], (4 * hidden_size,), kH),
        "mlp": [],
    }

    dims = [hidden_size] + list(mlp_units)
    for li in range(len(mlp_units)):
        fan_in, fan_out = dims[li], dims[li + 1]
        bound = 1.0 / np.sqrt(fan_in)
        w = u(keys[4 + 2 * li], (fan_out, fan_in), bound)   # PyTorch (out, in)
        b = u(keys[5 + 2 * li], (fan_out,), bound)
        params["mlp"].append((w, b))
    return params


def prepare_kernel_params(params):
    """One-time (outside jit) weight preprocessing: transposes, LSTM bias
    merge, exact MLP fold (no activations between Linears; Dropout identity
    at inference), class-lane padding."""
    w_f = None
    b_f = None
    for (w, b) in params["mlp"]:
        wt = w.T                                            # (in, out)
        if w_f is None:
            w_f, b_f = wt, b
        else:
            w_f = w_f @ wt
            b_f = b_f @ wt + b
    C = w_f.shape[1]
    Cp = ((C + _LANE - 1) // _LANE) * _LANE
    w_f = jnp.pad(w_f, ((0, 0), (0, Cp - C)))
    b_f = jnp.pad(b_f, ((0, Cp - C),), constant_values=-1e30)

    kernel_params = {
        "wih_t": params["weight_ih"].T,                     # (I, 4H)
        "whh_t": params["weight_hh"].T,                     # (H, 4H)
        "b_lstm": (params["bias_ih"] + params["bias_hh"])[None, :],   # (1, 4H)
        "w_mlp": w_f,                                       # (H, Cp)
        "b_mlp": b_f[None, :],                              # (1, Cp)
    }
    return kernel_params, C


# ---------------------------------------------------------------------------
# Pure-JAX reference (silent correctness check; uses the UNFOLDED layers)
# ---------------------------------------------------------------------------
def reference_forward(X, params):
    H = params["weight_hh"].shape[1]
    wih_t = params["weight_ih"].T
    whh_t = params["weight_hh"].T
    b = params["bias_ih"] + params["bias_hh"]

    def cell(carry, x_t):
        h, c = carry
        gates = x_t @ wih_t + h @ whh_t + b
        i_g = jax.nn.sigmoid(gates[:, 0 * H:1 * H])
        f_g = jax.nn.sigmoid(gates[:, 1 * H:2 * H])
        g_g = jnp.tanh(gates[:, 2 * H:3 * H])
        o_g = jax.nn.sigmoid(gates[:, 3 * H:4 * H])
        c = f_g * c + i_g * g_g
        h = o_g * jnp.tanh(c)
        return (h, c), None

    h0 = jnp.zeros((X.shape[0], H), jnp.float32)
    (h, _), _ = jax.lax.scan(cell, (h0, h0), jnp.transpose(X, (1, 0, 2)))
    y = h
    for (w, bb) in params["mlp"]:
        y = y @ w.T + bb
    return jax.nn.softmax(y, axis=1)


if __name__ == "__main__":
    # Small shapes consistent with the module: input_size=32, hidden_size=32,
    # batch N=2, sequence length T=8, num_classes = mlp_units[-1] = 11.
    input_size, hidden_size = 32, 32
    N, T = 2, 8

    key = jax.random.PRNGKey(0)
    kx, kp = jax.random.split(key)
    X = jax.random.normal(kx, (N, T, input_size), dtype=jnp.float32)
    params = make_params(kp, input_size, hidden_size)
    kernel_params, num_classes = prepare_kernel_params(params)

    out = jax.block_until_ready(
        classification_model_forward(X, kernel_params, num_classes))

    ref = reference_forward(X, params)
    # Modest tolerance: the softmax normalizer uses the EUP approximate
    # reciprocal (pl.reciprocal(approx=True)) and the MLP fold reorders
    # fp32 accumulation.
    np.testing.assert_allclose(np.asarray(out), np.asarray(ref),
                               rtol=2e-3, atol=2e-3)
    assert out.shape == (N, num_classes)
    np.testing.assert_allclose(np.asarray(out).sum(axis=1), np.ones(N),
                               rtol=2e-3, atol=2e-3)

    print("KERNEL_OK")
</pallas_src>

<mosaic_0001>
module attributes {stable_mosaic.version = 11 : i64} {
  func.func @_cls_model_kernel(%arg0: memref<8x8x32xf32, #tpu.memory_space<vmem>>, %arg1: memref<32x128xf32, #tpu.memory_space<vmem>>, %arg2: memref<32x128xf32, #tpu.memory_space<vmem>>, %arg3: memref<1x128xf32, #tpu.memory_space<vmem>>, %arg4: memref<32x128xf32, #tpu.memory_space<vmem>>, %arg5: memref<1x128xf32, #tpu.memory_space<vmem>>, %arg6: memref<8x128xf32, #tpu.memory_space<vmem>>) attributes {dimension_semantics = [], scalar_prefetch = 0 : i64, scratch_operands = 0 : i64, tpu.core_type = #tpu.core_type<tc>} {
    %c0 = arith.constant 0 : index
    %c0_0 = arith.constant 0 : index
    %0 = vector.load %arg2[%c0, %c0_0] : memref<32x128xf32, #tpu.memory_space<vmem>>, vector<32x128xf32>
    %c0_1 = arith.constant 0 : index
    %c0_2 = arith.constant 0 : index
    %c0_3 = arith.constant 0 : index
    %1 = vector.load %arg0[%c0_1, %c0_2, %c0_3] : memref<8x8x32xf32, #tpu.memory_space<vmem>>, vector<8x8x32xf32>
    %2 = vector.shape_cast %1 : vector<8x8x32xf32> to vector<64x32xf32>
    %c0_4 = arith.constant 0 : index
    %c0_5 = arith.constant 0 : index
    %3 = vector.load %arg1[%c0_4, %c0_5] : memref<32x128xf32, #tpu.memory_space<vmem>>, vector<32x128xf32>
    %cst = arith.constant dense<0.000000e+00> : vector<64x128xf32>
    %4 = tpu.matmul %2, %3, %cst {dimension_numbers = #tpu.dot_dimension_numbers<[1], [0], [0], [1], [0, 0, 1, 1], [], []>} : vector<64x32xf32>, vector<32x128xf32>, vector<64x128xf32> -> vector<64x128xf32>
    %c0_6 = arith.constant 0 : index
    %c0_7 = arith.constant 0 : index
    %5 = vector.load %arg3[%c0_6, %c0_7] : memref<1x128xf32, #tpu.memory_space<vmem>>, vector<1x128xf32>
    %6 = vector.broadcast %5 : vector<1x128xf32> to vector<64x128xf32>
    %7 = arith.addf %4, %6 : vector<64x128xf32>
    %8 = vector.shape_cast %7 : vector<64x128xf32> to vector<8x8x128xf32>
    %cst_8 = arith.constant 0.000000e+00 : f32
    %9 = vector.broadcast %cst_8 : f32 to vector<8x32xf32>
    %cst_9 = arith.constant 0.000000e+00 : f32
    %10 = vector.broadcast %cst_9 : f32 to vector<8x32xf32>
    %11 = vector.extract_strided_slice %8 {offsets = [0, 0, 0], sizes = [8, 1, 128], strides = [1, 1, 1]} : vector<8x8x128xf32> to vector<8x1x128xf32>
    %12 = vector.shape_cast %11 : vector<8x1x128xf32> to vector<8x128xf32>
    %cst_10 = arith.constant dense<0.000000e+00> : vector<8x128xf32>
    %13 = tpu.matmul %9, %0, %cst_10 {dimension_numbers = #tpu.dot_dimension_numbers<[1], [0], [0], [1], [0, 0, 1, 1], [], []>} : vector<8x32xf32>, vector<32x128xf32>, vector<8x128xf32> -> vector<8x128xf32>
    %14 = arith.addf %12, %13 : vector<8x128xf32>
    %15 = arith.negf %14 : vector<8x128xf32>
    %16 = math.exp %15 : vector<8x128xf32>
    %cst_11 = arith.constant 1.000000e+00 : f32
    %17 = vector.broadcast %cst_11 : f32 to vector<8x128xf32>
    %18 = arith.addf %17, %16 : vector<8x128xf32>
    %19 = arith.divf %17, %18 : vector<8x128xf32>
    %20 = vector.extract_strided_slice %19 {offsets = [0, 0], sizes = [8, 32], strides = [1, 1]} : vector<8x128xf32> to vector<8x32xf32>
    %21 = vector.extract_strided_slice %19 {offsets = [0, 32], sizes = [8, 32], strides = [1, 1]} : vector<8x128xf32> to vector<8x32xf32>
    %22 = vector.extract_strided_slice %19 {offsets = [0, 96], sizes = [8, 32], strides = [1, 1]} : vector<8x128xf32> to vector<8x32xf32>
    %23 = vector.extract_strided_slice %14 {offsets = [0, 64], sizes = [8, 32], strides = [1, 1]} : vector<8x128xf32> to vector<8x32xf32>
    %24 = math.tanh %23 : vector<8x32xf32>
    %25 = arith.mulf %21, %10 : vector<8x32xf32>
    %26 = arith.mulf %20, %24 : vector<8x32xf32>
    %27 = arith.addf %25, %26 : vector<8x32xf32>
    %28 = math.tanh %27 : vector<8x32xf32>
    %29 = arith.mulf %22, %28 : vector<8x32xf32>
    %30 = vector.extract_strided_slice %8 {offsets = [0, 1, 0], sizes = [8, 1, 128], strides = [1, 1, 1]} : vector<8x8x128xf32> to vector<8x1x128xf32>
    %31 = vector.shape_cast %30 : vector<8x1x128xf32> to vector<8x128xf32>
    %cst_12 = arith.constant dense<0.000000e+00> : vector<8x128xf32>
    %32 = tpu.matmul %29, %0, %cst_12 {dimension_numbers = #tpu.dot_dimension_numbers<[1], [0], [0], [1], [0, 0, 1, 1], [], []>} : vector<8x32xf32>, vector<32x128xf32>, vector<8x128xf32> -> vector<8x128xf32>
    %33 = arith.addf %31, %32 : vector<8x128xf32>
    %34 = arith.negf %33 : vector<8x128xf32>
    %35 = math.exp %34 : vector<8x128xf32>
    %cst_13 = arith.constant 1.000000e+00 : f32
    %36 = vector.broadcast %cst_13 : f32 to vector<8x128xf32>
    %37 = arith.addf %36, %35 : vector<8x128xf32>
    %38 = arith.divf %36, %37 : vector<8x128xf32>
    %39 = vector.extract_strided_slice %38 {offsets = [0, 0], sizes = [8, 32], strides = [1, 1]} : vector<8x128xf32> to vector<8x32xf32>
    %40 = vector.extract_strided_slice %38 {offsets = [0, 32], sizes = [8, 32], strides = [1, 1]} : vector<8x128xf32> to vector<8x32xf32>
    %41 = vector.extract_strided_slice %38 {offsets = [0, 96], sizes = [8, 32], strides = [1, 1]} : vector<8x128xf32> to vector<8x32xf32>
    %42 = vector.extract_strided_slice %33 {offsets = [0, 64], sizes = [8, 32], strides = [1, 1]} : vector<8x128xf32> to vector<8x32xf32>
    %43 = math.tanh %42 : vector<8x32xf32>
    %44 = arith.mulf %40, %27 : vector<8x32xf32>
    %45 = arith.mulf %39, %43 : vector<8x32xf32>
    %46 = arith.addf %44, %45 : vector<8x32xf32>
    %47 = math.tanh %46 : vector<8x32xf32>
    %48 = arith.mulf %41, %47 : vector<8x32xf32>
    %49 = vector.extract_strided_slice %8 {offsets = [0, 2, 0], sizes = [8, 1, 128], strides = [1, 1, 1]} : vector<8x8x128xf32> to vector<8x1x128xf32>
    %50 = vector.shape_cast %49 : vector<8x1x128xf32> to vector<8x128xf32>
    %cst_14 = arith.constant dense<0.000000e+00> : vector<8x128xf32>
    %51 = tpu.matmul %48, %0, %cst_14 {dimension_numbers = #tpu.dot_dimension_numbers<[1], [0], [0], [1], [0, 0, 1, 1], [], []>} : vector<8x32xf32>, vector<32x128xf32>, vector<8x128xf32> -> vector<8x128xf32>
    %52 = arith.addf %50, %51 : vector<8x128xf32>
    %53 = arith.negf %52 : vector<8x128xf32>
    %54 = math.exp %53 : vector<8x128xf32>
    %cst_15 = arith.constant 1.000000e+00 : f32
    %55 = vector.broadcast %cst_15 : f32 to vector<8x128xf32>
    %56 = arith.addf %55, %54 : vector<8x128xf32>
    %57 = arith.divf %55, %56 : vector<8x128xf32>
    %58 = vector.extract_strided_slice %57 {offsets = [0, 0], sizes = [8, 32], strides = [1, 1]} : vector<8x128xf32> to vector<8x32xf32>
    %59 = vector.extract_strided_slice %57 {offsets = [0, 32], sizes = [8, 32], strides = [1, 1]} : vector<8x128xf32> to vector<8x32xf32>
    %60 = vector.extract_strided_slice %57 {offsets = [0, 96], sizes = [8, 32], strides = [1, 1]} : vector<8x128xf32> to vector<8x32xf32>
    %61 = vector.extract_strided_slice %52 {offsets = [0, 64], sizes = [8, 32], strides = [1, 1]} : vector<8x128xf32> to vector<8x32xf32>
    %62 = math.tanh %61 : vector<8x32xf32>
    %63 = arith.mulf %59, %46 : vector<8x32xf32>
    %64 = arith.mulf %58, %62 : vector<8x32xf32>
    %65 = arith.addf %63, %64 : vector<8x32xf32>
    %66 = math.tanh %65 : vector<8x32xf32>
    %67 = arith.mulf %60, %66 : vector<8x32xf32>
    %68 = vector.extract_strided_slice %8 {offsets = [0, 3, 0], sizes = [8, 1, 128], strides = [1, 1, 1]} : vector<8x8x128xf32> to vector<8x1x128xf32>
    %69 = vector.shape_cast %68 : vector<8x1x128xf32> to vector<8x128xf32>
    %cst_16 = arith.constant dense<0.000000e+00> : vector<8x128xf32>
    %70 = tpu.matmul %67, %0, %cst_16 {dimension_numbers = #tpu.dot_dimension_numbers<[1], [0], [0], [1], [0, 0, 1, 1], [], []>} : vector<8x32xf32>, vector<32x128xf32>, vector<8x128xf32> -> vector<8x128xf32>
    %71 = arith.addf %69, %70 : vector<8x128xf32>
    %72 = arith.negf %71 : vector<8x128xf32>
    %73 = math.exp %72 : vector<8x128xf32>
    %cst_17 = arith.constant 1.000000e+00 : f32
    %74 = vector.broadcast %cst_17 : f32 to vector<8x128xf32>
    %75 = arith.addf %74, %73 : vector<8x128xf32>
    %76 = arith.divf %74, %75 : vector<8x128xf32>
    %77 = vector.extract_strided_slice %76 {offsets = [0, 0], sizes = [8, 32], strides = [1, 1]} : vector<8x128xf32> to vector<8x32xf32>
    %78 = vector.extract_strided_slice %76 {offsets = [0, 32], sizes = [8, 32], strides = [1, 1]} : vector<8x128xf32> to vector<8x32xf32>
    %79 = vector.extract_strided_slice %76 {offsets = [0, 96], sizes = [8, 32], strides = [1, 1]} : vector<8x128xf32> to vector<8x32xf32>
    %80 = vector.extract_strided_slice %71 {offsets = [0, 64], sizes = [8, 32], strides = [1, 1]} : vector<8x128xf32> to vector<8x32xf32>
    %81 = math.tanh %80 : vector<8x32xf32>
    %82 = arith.mulf %78, %65 : vector<8x32xf32>
    %83 = arith.mulf %77, %81 : vector<8x32xf32>
    %84 = arith.addf %82, %83 : vector<8x32xf32>
    %85 = math.tanh %84 : vector<8x32xf32>
    %86 = arith.mulf %79, %85 : vector<8x32xf32>
    %87 = vector.extract_strided_slice %8 {offsets = [0, 4, 0], sizes = [8, 1, 128], strides = [1, 1, 1]} : vector<8x8x128xf32> to vector<8x1x128xf32>
    %88 = vector.shape_cast %87 : vector<8x1x128xf32> to vector<8x128xf32>
    %cst_18 = arith.constant dense<0.000000e+00> : vector<8x128xf32>
    %89 = tpu.matmul %86, %0, %cst_18 {dimension_numbers = #tpu.dot_dimension_numbers<[1], [0], [0], [1], [0, 0, 1, 1], [], []>} : vector<8x32xf32>, vector<32x128xf32>, vector<8x128xf32> -> vector<8x128xf32>
    %90 = arith.addf %88, %89 : vector<8x128xf32>
    %91 = arith.negf %90 : vector<8x128xf32>
    %92 = math.exp %91 : vector<8x128xf32>
    %cst_19 = arith.constant 1.000000e+00 : f32
    %93 = vector.broadcast %cst_19 : f32 to vector<8x128xf32>
    %94 = arith.addf %93, %92 : vector<8x128xf32>
    %95 = arith.divf %93, %94 : vector<8x128xf32>
    %96 = vector.extract_strided_slice %95 {offsets = [0, 0], sizes = [8, 32], strides = [1, 1]} : vector<8x128xf32> to vector<8x32xf32>
    %97 = vector.extract_strided_slice %95 {offsets = [0, 32], sizes = [8, 32], strides = [1, 1]} : vector<8x128xf32> to vector<8x32xf32>
    %98 = vector.extract_strided_slice %95 {offsets = [0, 96], sizes = [8, 32], strides = [1, 1]} : vector<8x128xf32> to vector<8x32xf32>
    %99 = vector.extract_strided_slice %90 {offsets = [0, 64], sizes = [8, 32], strides = [1, 1]} : vector<8x128xf32> to vector<8x32xf32>
    %100 = math.tanh %99 : vector<8x32xf32>
    %101 = arith.mulf %97, %84 : vector<8x32xf32>
    %102 = arith.mulf %96, %100 : vector<8x32xf32>
    %103 = arith.addf %101, %102 : vector<8x32xf32>
    %104 = math.tanh %103 : vector<8x32xf32>
    %105 = arith.mulf %98, %104 : vector<8x32xf32>
    %106 = vector.extract_strided_slice %8 {offsets = [0, 5, 0], sizes = [8, 1, 128], strides = [1, 1, 1]} : vector<8x8x128xf32> to vector<8x1x128xf32>
    %107 = vector.shape_cast %106 : vector<8x1x128xf32> to vector<8x128xf32>
    %cst_20 = arith.constant dense<0.000000e+00> : vector<8x128xf32>
    %108 = tpu.matmul %105, %0, %cst_20 {dimension_numbers = #tpu.dot_dimension_numbers<[1], [0], [0], [1], [0, 0, 1, 1], [], []>} : vector<8x32xf32>, vector<32x128xf32>, vector<8x128xf32> -> vector<8x128xf32>
    %109 = arith.addf %107, %108 : vector<8x128xf32>
    %110 = arith.negf %109 : vector<8x128xf32>
    %111 = math.exp %110 : vector<8x128xf32>
    %cst_21 = arith.constant 1.000000e+00 : f32
    %112 = vector.broadcast %cst_21 : f32 to vector<8x128xf32>
    %113 = arith.addf %112, %111 : vector<8x128xf32>
    %114 = arith.divf %112, %113 : vector<8x128xf32>
    %115 = vector.extract_strided_slice %114 {offsets = [0, 0], sizes = [8, 32], strides = [1, 1]} : vector<8x128xf32> to vector<8x32xf32>
    %116 = vector.extract_strided_slice %114 {offsets = [0, 32], sizes = [8, 32], strides = [1, 1]} : vector<8x128xf32> to vector<8x32xf32>
    %117 = vector.extract_strided_slice %114 {offsets = [0, 96], sizes = [8, 32], strides = [1, 1]} : vector<8x128xf32> to vector<8x32xf32>
    %118 = vector.extract_strided_slice %109 {offsets = [0, 64], sizes = [8, 32], strides = [1, 1]} : vector<8x128xf32> to vector<8x32xf32>
    %119 = math.tanh %118 : vector<8x32xf32>
    %120 = arith.mulf %116, %103 : vector<8x32xf32>
    %121 = arith.mulf %115, %119 : vector<8x32xf32>
    %122 = arith.addf %120, %121 : vector<8x32xf32>
    %123 = math.tanh %122 : vector<8x32xf32>
    %124 = arith.mulf %117, %123 : vector<8x32xf32>
    %125 = vector.extract_strided_slice %8 {offsets = [0, 6, 0], sizes = [8, 1, 128], strides = [1, 1, 1]} : vector<8x8x128xf32> to vector<8x1x128xf32>
    %126 = vector.shape_cast %125 : vector<8x1x128xf32> to vector<8x128xf32>
    %cst_22 = arith.constant dense<0.000000e+00> : vector<8x128xf32>
    %127 = tpu.matmul %124, %0, %cst_22 {dimension_numbers = #tpu.dot_dimension_numbers<[1], [0], [0], [1], [0, 0, 1, 1], [], []>} : vector<8x32xf32>, vector<32x128xf32>, vector<8x128xf32> -> vector<8x128xf32>
    %128 = arith.addf %126, %127 : vector<8x128xf32>
    %129 = arith.negf %128 : vector<8x128xf32>
    %130 = math.exp %129 : vector<8x128xf32>
    %cst_23 = arith.constant 1.000000e+00 : f32
    %131 = vector.broadcast %cst_23 : f32 to vector<8x128xf32>
    %132 = arith.addf %131, %130 : vector<8x128xf32>
    %133 = arith.divf %131, %132 : vector<8x128xf32>
    %134 = vector.extract_strided_slice %133 {offsets = [0, 0], sizes = [8, 32], strides = [1, 1]} : vector<8x128xf32> to vector<8x32xf32>
    %135 = vector.extract_strided_slice %133 {offsets = [0, 32], sizes = [8, 32], strides = [1, 1]} : vector<8x128xf32> to vector<8x32xf32>
    %136 = vector.extract_strided_slice %133 {offsets = [0, 96], sizes = [8, 32], strides = [1, 1]} : vector<8x128xf32> to vector<8x32xf32>
    %137 = vector.extract_strided_slice %128 {offsets = [0, 64], sizes = [8, 32], strides = [1, 1]} : vector<8x128xf32> to vector<8x32xf32>
    %138 = math.tanh %137 : vector<8x32xf32>
    %139 = arith.mulf %135, %122 : vector<8x32xf32>
    %140 = arith.mulf %134, %138 : vector<8x32xf32>
    %141 = arith.addf %139, %140 : vector<8x32xf32>
    %142 = math.tanh %141 : vector<8x32xf32>
    %143 = arith.mulf %136, %142 : vector<8x32xf32>
    %144 = vector.extract_strided_slice %8 {offsets = [0, 7, 0], sizes = [8, 1, 128], strides = [1, 1, 1]} : vector<8x8x128xf32> to vector<8x1x128xf32>
    %145 = vector.shape_cast %144 : vector<8x1x128xf32> to vector<8x128xf32>
    %cst_24 = arith.constant dense<0.000000e+00> : vector<8x128xf32>
    %146 = tpu.matmul %143, %0, %cst_24 {dimension_numbers = #tpu.dot_dimension_numbers<[1], [0], [0], [1], [0, 0, 1, 1], [], []>} : vector<8x32xf32>, vector<32x128xf32>, vector<8x128xf32> -> vector<8x128xf32>
    %147 = arith.addf %145, %146 : vector<8x128xf32>
    %148 = arith.negf %147 : vector<8x128xf32>
    %149 = math.exp %148 : vector<8x128xf32>
    %cst_25 = arith.constant 1.000000e+00 : f32
    %150 = vector.broadcast %cst_25 : f32 to vector<8x128xf32>
    %151 = arith.addf %150, %149 : vector<8x128xf32>
    %152 = arith.divf %150, %151 : vector<8x128xf32>
    %153 = vector.extract_strided_slice %152 {offsets = [0, 0], sizes = [8, 32], strides = [1, 1]} : vector<8x128xf32> to vector<8x32xf32>
    %154 = vector.extract_strided_slice %152 {offsets = [0, 32], sizes = [8, 32], strides = [1, 1]} : vector<8x128xf32> to vector<8x32xf32>
    %155 = vector.extract_strided_slice %152 {offsets = [0, 96], sizes = [8, 32], strides = [1, 1]} : vector<8x128xf32> to vector<8x32xf32>
    %156 = vector.extract_strided_slice %147 {offsets = [0, 64], sizes = [8, 32], strides = [1, 1]} : vector<8x128xf32> to vector<8x32xf32>
    %157 = math.tanh %156 : vector<8x32xf32>
    %158 = arith.mulf %154, %141 : vector<8x32xf32>
    %159 = arith.mulf %153, %157 : vector<8x32xf32>
    %160 = arith.addf %158, %159 : vector<8x32xf32>
    %161 = math.tanh %160 : vector<8x32xf32>
    %162 = arith.mulf %155, %161 : vector<8x32xf32>
    %c0_26 = arith.constant 0 : index
    %c0_27 = arith.constant 0 : index
    %163 = vector.load %arg4[%c0_26, %c0_27] : memref<32x128xf32, #tpu.memory_space<vmem>>, vector<32x128xf32>
    %cst_28 = arith.constant dense<0.000000e+00> : vector<8x128xf32>
    %164 = tpu.matmul %162, %163, %cst_28 {dimension_numbers = #tpu.dot_dimension_numbers<[1], [0], [0], [1], [0, 0, 1, 1], [], []>} : vector<8x32xf32>, vector<32x128xf32>, vector<8x128xf32> -> vector<8x128xf32>
    %c0_29 = arith.constant 0 : index
    %c0_30 = arith.constant 0 : index
    %165 = vector.load %arg5[%c0_29, %c0_30] : memref<1x128xf32, #tpu.memory_space<vmem>>, vector<1x128xf32>
    %166 = vector.broadcast %165 : vector<1x128xf32> to vector<8x128xf32>
    %167 = arith.addf %164, %166 : vector<8x128xf32>
    %cst_31 = arith.constant dense<0xFF800000> : vector<8xf32>
    %168 = vector.multi_reduction <maximumf>, %167, %cst_31 [1] : vector<8x128xf32> to vector<8xf32>
    %169 = vector.shape_cast %168 : vector<8xf32> to vector<8x1xf32>
    %170 = vector.broadcast %169 : vector<8x1xf32> to vector<8x128xf32>
    %171 = arith.subf %167, %170 : vector<8x128xf32>
    %172 = math.exp %171 : vector<8x128xf32>
    %cst_32 = arith.constant dense<0.000000e+00> : vector<8xf32>
    %173 = vector.multi_reduction <add>, %172, %cst_32 [1] : vector<8x128xf32> to vector<8xf32>
    %174 = vector.shape_cast %173 : vector<8xf32> to vector<8x1xf32>
    %175 = tpu.reciprocal %174 {approx = true} : vector<8x1xf32> -> vector<8x1xf32>
    %176 = vector.broadcast %175 : vector<8x1xf32> to vector<8x128xf32>
    %177 = arith.mulf %172, %176 : vector<8x128xf32>
    %c0_33 = arith.constant 0 : index
    %c0_34 = arith.constant 0 : index
    %178 = vector.load %arg6[%c0_33, %c0_34] : memref<8x128xf32, #tpu.memory_space<vmem>>, vector<8x128xf32>
    tpu.vector_store %arg6[%c0_33, %c0_34], %177 {strides = array<i32>} : memref<8x128xf32, #tpu.memory_space<vmem>>, vector<8x128xf32>,
    return
  }
}

</mosaic_0001>

<bundles_post_ra>
// kernel: classification_model_forward.1
= control target key start
LH: loop header
LB: loop body
LE: loop exit
PB: predicated region body
PF: predicated region fallthrough
CT: control target
= control target key end

     0   :  { %11 = vsyncpa [#allocation3], 0  ;;  %s3828_s21 = smov [#allocation2]   ;;  %s4893_s0 = inlined_call_operand.vmem [shape: f32[8,8,32], index: 0, kind: input, shape index: {}]   ;;  %s4894_s1 = inlined_call_operand.vmem [shape: f32[32,128], index: 1, kind: input, shape index: {}]   ;;  %s4895_s2 = inlined_call_operand.vmem [shape: f32[32,128], index: 2, kind: input, shape index: {}]   ;;  %s4896_s3 = inlined_call_operand.vmem [shape: f32[1,128], index: 3, kind: input, shape index: {}]   ;;  %s4897_s4 = inlined_call_operand.hbm [shape: f32[32,128], index: 4, kind: input, shape index: {}]   ;;  %s4898_s5 = inlined_call_operand.vmem [shape: f32[1,128], index: 5, kind: input, shape index: {}]   ;;  %s4899_s6 = inlined_call_operand.vmem [shape: f32[8,128], index: 6, kind: output, shape index: {}]  }
   0x1   :  { %s25_s22 = sshll.u32 %s3828_s21, 4  ;;  %s3804_s25 = scalar_lea.hbm %s4897_s4, 512  ;;  %s26_s22 = int_to_ptr.vmem [resolvable:$true] %s25_s22 }
   0x2   :  { %p3805_p0 = scmp.ne.s32.totalorder %s4897_s4, %s3804_s25  ;;  %p3808_p1 = scmp.lt.u32.totalorder %s3804_s25, %s4897_s4 }
   0x4   :  { %p3810_p2 = pnand %p3808_p1, %p3805_p0 }
   0x6   :  { %3813 = shalt.err (!%p3810_p2)
}
   0x7   :  { %s3814_s30 = scalar_lea.vmem %s26_s22, 512  ;;  %p3819_p4 = scmp.lt.s32.totalorder %s26_s22, %s26_s22 }
   0x8   :  { %p3815_p3 = scmp.ne.s32.totalorder %s26_s22, %s3814_s30  ;;  %p3820_p5 = scmp.lt.s32.totalorder %s3814_s30, %s3814_s30 }
   0xa   :  { %p3821_p6 = por %p3820_p5, %p3819_p4 }
   0xc   :  { %p3822_p7 = pnand %p3821_p6, %p3815_p3 }
   0xe   :  { %3825 = shalt.err (!%p3822_p7)
}
   0xf   :  { %s3829_s7 = smov 128   ;;  %s3830_s8 = smov 8  }
  0x10   :  { %31 = dma.hbm_to_vmem [thread:$0]  %s4897_s4, 512, %s26_s22, [#allocation3], %s3829_s7, %s3829_s7, %s3830_s8  }
  0x11   :  { %3826 = dma.done.wait [#allocation3], 512  }
  0x12   :  { %3827 = vsyncadd [#allocation3], 4294966784  ;;  %v3831_v0 = vmov 0.0|0.0   ;;  %vm3832_vm0 = vmmov 0   ;;  %v3833_v1 = vmov 0.0   ;;  %v49_v2 = vld [vmem:[%s4894_s1] sm:$0xff] }
  0x13   :  { %3226 = vmatprep.subr.bf16.mxu1 %v3831_v0  ;;  %3127 = vmatprep.mubr.msk.f32.mxu1 %vm3832_vm0, %v3833_v1  ;;  %v50_v3 = vld [vmem:[%s4894_s1 + $0x8] sm:$0xff]  ;;  %v37_v4 = vld [vmem:[%s4895_s2] sm:$0xff]  ;;  %vm60_vm1 = vcmask 261120   ;;  %v51_v7 = vld [vmem:[%s4894_s1 + $0x10] sm:$0xff]  ;;  %vm488_vm2 = vcmask 1041409   ;;  %vm491_vm3 = vcmask 1042434  }
  0x14   :  { %v3218_v5 = vpack.c.bf16 %v50_v3, %v49_v2  ;;  %v38_v6 = vld [vmem:[%s4895_s2 + $0x8] sm:$0xff]  ;;  %v52_v8 = vld [vmem:[%s4894_s1 + $0x18] sm:$0xff]  ;;  %v39_v11 = vld [vmem:[%s4895_s2 + $0x10] sm:$0xff]  ;;  %vm494_vm4 = vcmask 1043459   ;;  %vm497_vm5 = vcmask 1044484   ;;  %vm500_vm6 = vcmask 1045509  }
  0x15   :  { %v3904_v9 = vpack.c.bf16 %v38_v6, %v37_v4  ;;  %v3222_v10 = vpack.c.bf16 %v52_v8, %v51_v7  ;;  %v40_v12 = vld [vmem:[%s4895_s2 + $0x18] sm:$0xff]  ;;  %v41_v13 = vld [vmem:[%s4893_s0] sm:$0xff]  ;;  %v42_v15 = vld [vmem:[%s4893_s0 + $0x8] sm:$0xff]  ;;  %vm503_vm7 = vcmask 1046534   ;;  %vm506_vm8 = vcmask 1047559  }
  0x16   :  { %3219 = vmatprep.subr.bf16.mxu0 %v3218_v5  ;;  %3107 = vmatprep.mubr.msk.f32.mxu0 %vm60_vm1, %v41_v13  ;;  %v3917_v14 = vpack.c.bf16 %v40_v12, %v39_v11  ;;  %v43_v16 = vld [vmem:[%s4893_s0 + $0x10] sm:$0xff]  ;;  %v44_v17 = vld [vmem:[%s4893_s0 + $0x18] sm:$0xff]  ;;  %v45_v18 = vld [vmem:[%s4893_s0 + $0x20] sm:$0xff] }
  0x17   :  { %3221 = vmatpush3.bf16.msra.mxu0 %v3218_v5  ;;  %3228 = vmatpush3.bf16.msra.mxu1 %v3904_v9  ;;  %v46_v19 = vld [vmem:[%s4893_s0 + $0x28] sm:$0xff]  ;;  %v47_v20 = vld [vmem:[%s4893_s0 + $0x30] sm:$0xff]  ;;  %v48_v21 = vld [vmem:[%s4893_s0 + $0x38] sm:$0xff]  ;;  %s3834_s0 = smov 64  }
  0x18   :  { %3223 = vmatprep.subr.bf16.mxu0 %v3222_v10  ;;  %3229 = vmatprep.subr.bf16.mxu1 %v3831_v0  ;;  %v2960_v22 = vld [vmem:[%s4896_s3] ss:$0 sm:$0xff]  ;;  %s3835_s3 = smov 32  }
  0x1b   :  { %3225 = vmatpush3.bf16.msra.mxu0 %v3222_v10  ;;  %3231 = vmatpush3.bf16.msra.mxu1 %v3917_v14 }
  0x1c   :  { %3232 = vmatprep.subr.bf16.mxu1 %v3831_v0  ;;  %3238 = vmatprep.subr.bf16.mxu0 %v3831_v0 }
  0x1e   :  { %3108 = vmatmul.mubr.msk.f32.vlgmr.msra.gmra.mrb[0].mxu0 %vm60_vm1, %v42_v15  ;;  %3128 = vmatmul.mubr.f32.vlgmr.msra.gmra.mrb[0].mxu1 %v3833_v1 }
  0x1f   :  { %3110 = vmatprep.mubr.msk.f32.mxu0 %vm60_vm1, %v43_v16  ;;  %3234 = vmatpush3.bf16.msra.mxu1 %v3904_v9 }
  0x20   :  { %3235 = vmatprep.subr.bf16.mxu1 %v3831_v0  ;;  %3138 = vmatprep.mubr.msk.f32.mxu1 %vm3832_vm0, %v3833_v1 }
  0x21   :  { %3240 = vmatpush3.bf16.msra.mxu0 %v3904_v9 }
  0x22   :  { %3111 = vmatmul.mubr.msk.f32.gmra.mrb[2].mxu0 %vm60_vm1, %v44_v17  ;;  %3241 = vmatprep.subr.bf16.mxu0 %v3831_v0 }
  0x23   :  { %3113 = vmatprep.mubr.msk.f32.mxu0 %vm60_vm1, %v45_v18  ;;  %3237 = vmatpush3.bf16.msra.mxu1 %v3917_v14 }
  0x24   :  { %3244 = vmatprep.subr.bf16.mxu1 %v3831_v0 }
  0x25   :  { %3243 = vmatpush3.bf16.msra.mxu0 %v3917_v14 }
  0x26   :  { %3114 = vmatmul.mubr.msk.f32.gmra.mrb[4].mxu0 %vm60_vm1, %v46_v19  ;;  %3250 = vmatprep.subr.bf16.mxu0 %v3831_v0 }
  0x27   :  { %3116 = vmatprep.mubr.msk.f32.mxu0 %vm60_vm1, %v47_v20 }
  0x2a   :  { %3117 = vmatmul.mubr.msk.f32.gmra.mrb[6].mxu0 %vm60_vm1, %v48_v21 }
  0x2b   :  { %3149 = vmatprep.mubr.msk.f32.mxu0 %vm3832_vm0, %v3833_v1 }
  0xf1   :  { %v3109_v23 = vpop.f32.mrb[0].mxu0  ;;  %v259_v24 = vpop.f32.mrb[0].mxu1 }
  0xf2   :  { %v3967_v25 = vadd.f32 %v3109_v23, %v2960_v22  ;;  %v151_v26 = vpop.f32.mrb[1].mxu0  ;;  %v3129_v27 = vpop.f32.mrb[1].mxu1  ;;  %v266_v29 = vrot.slane %v259_v24, 3  ;;  %v264_v30 = vrot.slane %v259_v24, 1  ;;  %v265_v37 = vrot.slane %v259_v24, 2 }
  0xf3   :  { %v3969_v28 = vadd.f32 %v2960_v22, %v151_v26  ;;  %v268_v40 = vrot.slane %v259_v24, 5  ;;  %v267_v45 = vrot.slane %v259_v24, 4  ;;  %v270_v48 = vrot.slane %v259_v24, 7 }
  0xf4   :  { %v280_v35 = vadd.f32 %v264_v30, %v3967_v25  ;;  %v269_v56 = vrot.slane %v259_v24, 6 }
  0xf5   :  { %v3112_v31 = vpop.f32.mrb[2].mxu0  ;;  %v279_v32 = vadd.f32 %v259_v24, %v3969_v28 }
  0xf6   :  { %v3972_v33 = vadd.f32 %v3112_v31, %v2960_v22  ;;  %v161_v34 = vpop.f32.mrb[3].mxu0  ;;  %v2970_v2 = vmul.f32 -1.442695, %v280_v35 }
  0xf7   :  { %v3975_v36 = vadd.f32 %v2960_v22, %v161_v34  ;;  %3288 = vtanh.f32 %v279_v32  ;;  %v2969_v4 = vmul.f32 -1.442695, %v279_v32 }
  0xf8   :  { %3290 = vtanh.f32 %v280_v35  ;;  %v282_v38 = vadd.f32 %v266_v29, %v3972_v33 }
  0xf9   :  { %v3115_v39 = vpop.f32.mrb[4].mxu0  ;;  %v281_v43 = vadd.f32 %v265_v37, %v3975_v36 }
  0xfa   :  { %v3978_v41 = vadd.f32 %v3115_v39, %v2960_v22  ;;  %v171_v42 = vpop.f32.mrb[5].mxu0  ;;  %3292 = vtanh.f32 %v282_v38  ;;  %v2972_v3 = vmul.f32 -1.442695, %v282_v38 }
  0xfb   :  { %v3981_v44 = vadd.f32 %v2960_v22, %v171_v42  ;;  %3294 = vtanh.f32 %v281_v43  ;;  %v2971_v5 = vmul.f32 -1.442695, %v281_v43 }
  0xfc   :  { %v284_v46 = vadd.f32 %v268_v40, %v3978_v41 }
  0xfd   :  { %v3118_v47 = vpop.f32.mrb[6].mxu0  ;;  %v283_v51 = vadd.f32 %v267_v45, %v3981_v44 }
  0xfe   :  { %v3984_v49 = vadd.f32 %v3118_v47, %v2960_v22  ;;  %v181_v50 = vpop.f32.mrb[7].mxu0  ;;  %3296 = vtanh.f32 %v284_v46  ;;  %v2974_v7 = vmul.f32 -1.442695, %v284_v46 }
  0xff   :  { %v3987_v52 = vadd.f32 %v2960_v22, %v181_v50  ;;  %3298 = vtanh.f32 %v283_v51  ;;  %v2973_v6 = vmul.f32 -1.442695, %v283_v51 }
 0x100   :  { %v286_v53 = vadd.f32 %v270_v48, %v3984_v49 }
 0x101   :  { %v3289_v54 = vpop.eup %3288  ;;  %v285_v57 = vadd.f32 %v269_v56, %v3987_v52 }
 0x102   :  { %v3291_v55 = vpop.eup %3290  ;;  %359 = vrot.lane.b32.xlu1 %v3289_v54, %s3834_s0  ;;  %3300 = vtanh.f32 %v286_v53  ;;  %v2976_v10 = vmul.f32 -1.442695, %v286_v53 }
 0x103   :  { %361 = vrot.lane.b32.xlu0 %v3291_v55, %s3834_s0  ;;  %3302 = vtanh.f32 %v285_v57  ;;  %v2975_v11 = vmul.f32 -1.442695, %v285_v57 }
 0x104   :  { %v3293_v58 = vpop.eup %3292  ;;  %3304 = vpow2.f32 %v2970_v2 }
 0x105   :  { %v3295_v59 = vpop.eup %3294  ;;  %3306 = vpow2.f32 %v2972_v3 }
 0x106   :  { %365 = vrot.lane.b32.xlu1 %v3293_v58, %s3834_s0  ;;  %3308 = vpow2.f32 %v2969_v4 }
 0x107   :  { %363 = vrot.lane.b32.xlu0 %v3295_v59, %s3834_s0  ;;  %3310 = vpow2.f32 %v2971_v5 }
 0x108   :  { %v3297_v60 = vpop.eup %3296  ;;  %3312 = vpow2.f32 %v2973_v6 }
 0x109   :  { %v3299_v61 = vpop.eup %3298  ;;  %3314 = vpow2.f32 %v2974_v7 }
 0x10a   :  { %369 = vrot.lane.b32.xlu1 %v3297_v60, %s3834_s0  ;;  %3316 = vpow2.f32 %v2976_v10 }
 0x10b   :  { %367 = vrot.lane.b32.xlu0 %v3299_v61, %s3834_s0  ;;  %3318 = vpow2.f32 %v2975_v11 }
 0x10c   :  { %v3301_v62 = vpop.eup %3300 }
 0x10d   :  { %v3303_v63 = vpop.eup %3302 }
 0x10e   :  { %373 = vrot.lane.b32.xlu1 %v3301_v62, %s3834_s0  ;;  %v3305_v8 = vpop.eup %3304 }
 0x10f   :  { %371 = vrot.lane.b32.xlu0 %v3303_v63, %s3834_s0  ;;  %v3307_v12 = vpop.eup %3306  ;;  %v312_v13 = vadd.f32 1.0, %v3305_v8 }
 0x110   :  { %v3309_v15 = vpop.eup %3308  ;;  %v314_v16 = vadd.f32 1.0, %v3307_v12 }
 0x111   :  { %v3311_v17 = vpop.eup %3310  ;;  %3320 = vrcp.f32 %v312_v13  ;;  %v311_v18 = vadd.f32 1.0, %v3309_v15 }
 0x112   :  { %v3313_v19 = vpop.eup %3312  ;;  %3322 = vrcp.f32 %v314_v16  ;;  %v313_v20 = vadd.f32 1.0, %v3311_v17 }
 0x113   :  { %v3315_v21 = vpop.eup %3314  ;;  %3324 = vrcp.f32 %v311_v18  ;;  %v315_v22 = vadd.f32 1.0, %v3313_v19 }
 0x114   :  { %3326 = vrcp.f32 %v313_v20  ;;  %v316_v23 = vadd.f32 1.0, %v3315_v21  ;;  %v3317_v24 = vpop.eup %3316 }
 0x115   :  { %v3319_v26 = vpop.eup %3318  ;;  %3328 = vrcp.f32 %v315_v22  ;;  %v318_v32 = vadd.f32 1.0, %v3317_v24 }
 0x116   :  { %3330 = vrcp.f32 %v316_v23  ;;  %v317_v34 = vadd.f32 1.0, %v3319_v26 }
 0x117   :  { %3332 = vrcp.f32 %v318_v32 }
 0x118   :  { %3334 = vrcp.f32 %v317_v34 }
 0x11b   :  { %v3999_v29 = vpop.eup %3320 }
 0x11c   :  { %v4002_v35 = vpop.eup %3322  ;;  %v344_v60 = vmul.f32 0.0, %v3999_v29 }
 0x11d   :  { %v4005_v38 = vpop.eup %3324  ;;  %v346_v63 = vmul.f32 0.0, %v4002_v35 }
 0x11e   :  { %v4010_v43 = vpop.eup %3326  ;;  %v343_v2 = vmul.f32 0.0, %v4005_v38 }
 0x11f   :  { %v4014_v47 = vpop.eup %3328  ;;  %v345_v7 = vmul.f32 0.0, %v4010_v43 }
 0x120   :  { %v4017_v50 = vpop.eup %3330  ;;  %v347_v11 = vmul.f32 0.0, %v4014_v47 }
 0x121   :  { %v4023_v55 = vpop.eup %3332  ;;  %v348_v13 = vmul.f32 0.0, %v4017_v50 }
 0x122   :  { %v4025_v56 = vpop.eup %3334  ;;  %v350_v19 = vmul.f32 0.0, %v4023_v55 }
 0x123   :  { %v349_v20 = vmul.f32 0.0, %v4025_v56 }
 0x174   :  { %v360_v27 = vpop.permute.xlu1 %359 }
 0x175   :  { %v362_v30 = vpop.permute.xlu0 %361  ;;  %v383_v40 = vmul.f32 %v4005_v38, %v360_v27 }
 0x176   :  { %v384_v31 = vmul.f32 %v3999_v29, %v362_v30 }
 0x178   :  { %401 = vrot.lane.b32.xlu0 %v384_v31, %s3835_s3  ;;  %v366_v37 = vpop.permute.xlu1 %365 }
 0x179   :  { %v386_v39 = vmul.f32 %v4002_v35, %v366_v37  ;;  %v364_v42 = vpop.permute.xlu0 %363 }
 0x17a   :  { %v385_v46 = vmul.f32 %v4010_v43, %v364_v42 }
 0x17b   :  { %405 = vrot.lane.b32.xlu1 %v386_v39, %s3835_s3 }
 0x17c   :  { %399 = vrot.lane.b32.xlu0 %v383_v40, %s3835_s3  ;;  %v370_v45 = vpop.permute.xlu1 %369 }
 0x17d   :  { %v368_v48 = vpop.permute.xlu0 %367  ;;  %v388_v53 = vmul.f32 %v4017_v50, %v370_v45 }
 0x17e   :  { %v387_v51 = vmul.f32 %v4014_v47, %v368_v48 }
 0x17f   :  { %403 = vrot.lane.b32.xlu1 %v385_v46, %s3835_s3 }
 0x180   :  { %407 = vrot.lane.b32.xlu0 %v387_v51, %s3835_s3  ;;  %v374_v54 = vpop.permute.xlu1 %373 }
 0x181   :  { %v390_v57 = vmul.f32 %v4023_v55, %v374_v54  ;;  %v372_v58 = vpop.permute.xlu0 %371 }
 0x182   :  { %v389_v59 = vmul.f32 %v4025_v56, %v372_v58 }
 0x183   :  { %409 = vrot.lane.b32.xlu1 %v388_v53, %s3835_s3 }
 0x184   :  { %411 = vrot.lane.b32.xlu0 %v389_v59, %s3835_s3 }
 0x187   :  { %413 = vrot.lane.b32.xlu1 %v390_v57, %s3835_s3 }
 0x1ea   :  { %v402_v61 = vpop.permute.xlu0 %401 }
 0x1eb   :  { %v4032_v62 = vadd.f32 %v402_v61, %v344_v60 }
 0x1ed   :  { %3336 = vtanh.f32 %v4032_v62  ;;  %v406_v3 = vpop.permute.xlu1 %405 }
 0x1ee   :  { %v400_v4 = vpop.permute.xlu0 %399  ;;  %v4037_v5 = vadd.f32 %v406_v3, %v346_v63 }
 0x1ef   :  { %v4039_v6 = vadd.f32 %v400_v4, %v343_v2 }
 0x1f0   :  { %3338 = vtanh.f32 %v4037_v5 }
 0x1f1   :  { %3340 = vtanh.f32 %v4039_v6  ;;  %v404_v8 = vpop.permute.xlu1 %403 }
 0x1f2   :  { %v4044_v10 = vadd.f32 %v404_v8, %v345_v7  ;;  %v408_v12 = vpop.permute.xlu0 %407 }
 0x1f3   :  { %v4049_v15 = vadd.f32 %v408_v12, %v347_v11 }
 0x1f4   :  { %3342 = vtanh.f32 %v4044_v10 }
 0x1f5   :  { %v410_v16 = vpop.permute.xlu1 %409  ;;  %3344 = vtanh.f32 %v4049_v15 }
 0x1f6   :  { %v4051_v17 = vadd.f32 %v410_v16, %v348_v13  ;;  %v412_v23 = vpop.permute.xlu0 %411 }
 0x1f7   :  { %v3337_v18 = vpop.eup %3336  ;;  %v4060_v27 = vadd.f32 %v412_v23, %v349_v20 }
 0x1f8   :  { %3346 = vtanh.f32 %v4051_v17  ;;  %449 = vrot.lane.b32.xlu0 %v3337_v18, %s3834_s0 }
 0x1f9   :  { %v414_v21 = vpop.permute.xlu1 %413 }
 0x1fa   :  { %v3339_v22 = vpop.eup %3338  ;;  %v4058_v24 = vadd.f32 %v414_v21, %v350_v19 }
 0x1fb   :  { %v3341_v26 = vpop.eup %3340  ;;  %453 = vrot.lane.b32.xlu1 %v3339_v22, %s3834_s0 }
 0x1fc   :  { %3348 = vtanh.f32 %v4058_v24  ;;  %447 = vrot.lane.b32.xlu0 %v3341_v26, %s3834_s0 }
 0x1fd   :  { %3350 = vtanh.f32 %v4060_v27 }
 0x1fe   :  { %v3343_v30 = vpop.eup %3342 }
 0x1ff   :  { %451 = vrot.lane.b32.xlu1 %v3343_v30, %s3834_s0  ;;  %v3345_v31 = vpop.eup %3344 }
 0x200   :  { %455 = vrot.lane.b32.xlu0 %v3345_v31, %s3834_s0 }
 0x202   :  { %v3347_v32 = vpop.eup %3346 }
 0x203   :  { %457 = vrot.lane.b32.xlu1 %v3347_v32, %s3834_s0 }
 0x206   :  { %v3349_v34 = vpop.eup %3348 }
 0x207   :  { %v3351_v37 = vpop.eup %3350  ;;  %461 = vrot.lane.b32.xlu1 %v3349_v34, %s3834_s0 }
 0x208   :  { %459 = vrot.lane.b32.xlu0 %v3351_v37, %s3834_s0 }
 0x26a   :  { %v450_v39 = vpop.permute.xlu0 %449 }
 0x26b   :  { %v472_v45 = vmul.f32 %v3999_v29, %v450_v39 }
 0x26d   :  { %v454_v40 = vpop.permute.xlu1 %453  ;;  %v487_v54 = vrot.slane %v472_v45, 7 }
 0x26e   :  { %v448_v42 = vpop.permute.xlu0 %447  ;;  %v474_v48 = vmul.f32 %v4002_v35, %v454_v40 }
 0x26f   :  { %v471_v46 = vmul.f32 %v4005_v38, %v448_v42 }
 0x270   :  { %v493_v60 = vrot.slane %v474_v48, 5 }
 0x271   :  { %v452_v51 = vpop.permute.xlu1 %451  ;;  %v489_v59 = vsel %vm488_vm2, %v487_v54, %v471_v46 }
 0x272   :  { %v473_v53 = vmul.f32 %v4010_v43, %v452_v51  ;;  %v456_v58 = vpop.permute.xlu0 %455 }
 0x273   :  { %v475_v61 = vmul.f32 %v4014_v47, %v456_v58 }
 0x274   :  { %v490_v57 = vrot.slane %v473_v53, 6 }
 0x275   :  { %v458_v63 = vpop.permute.xlu1 %457  ;;  %v496_v2 = vrot.slane %v475_v61, 4 }
 0x276   :  { %v492_v29 = vsel %vm491_vm3, %v490_v57, %v489_v59  ;;  %v476_v35 = vmul.f32 %v4017_v50, %v458_v63 }
 0x277   :  { %v495_v38 = vsel %vm494_vm4, %v493_v60, %v492_v29 }
 0x278   :  { %v499_v43 = vrot.slane %v476_v35, 3  ;;  %v498_v3 = vsel %vm497_vm5, %v496_v2, %v495_v38 }
 0x279   :  { %v462_v4 = vpop.permute.xlu1 %461 }
 0x27a   :  { %v460_v7 = vpop.permute.xlu0 %459  ;;  %v478_v8 = vmul.f32 %v4023_v55, %v462_v4  ;;  %v501_v12 = vsel %vm500_vm6, %v499_v43, %v498_v3 }
 0x27b   :  { %v477_v11 = vmul.f32 %v4025_v56, %v460_v7 }
 0x27c   :  { %v505_v47 = vrot.slane %v478_v8, 1 }
 0x27d   :  { %v502_v13 = vrot.slane %v477_v11, 2 }
 0x27f   :  { %v504_v50 = vsel %vm503_vm7, %v502_v13, %v501_v12 }
 0x280   :  { %v507_v16 = vsel %vm506_vm8, %v505_v47, %v504_v50 }
 0x281   :  { %508 = vrot.lane.b32.xlu0 %v507_v16, %s3835_s3 }
 0x2f3   :  { %v509_v18 = vpop.permute.xlu0 %508 }
 0x2f4   :  { %3139 = vmatmul.mubr.msk.f32.vlgmr.msra.gmra.mrb[2].mxu1 %vm60_vm1, %v509_v18 }
 0x2f5   :  { %3246 = vmatpush3.bf16.msra.mxu1 %v3904_v9  ;;  %3160 = vmatprep.mubr.msk.f32.mxu1 %vm3832_vm0, %v3833_v1 }
 0x2f6   :  { %3247 = vmatprep.subr.bf16.mxu1 %v3831_v0 }
 0x2f9   :  { %3249 = vmatpush3.bf16.msra.mxu1 %v3917_v14 }
 0x2fa   :  { %3256 = vmatprep.subr.bf16.mxu1 %v3831_v0 }
 0x3c7   :  { %v578_v55 = vpop.f32.mrb[2].mxu1 }
 0x3c8   :  { %v3140_v56 = vpop.f32.mrb[3].mxu1  ;;  %v584_v19 = vrot.slane %v578_v55, 1  ;;  %v583_v20 = vrot.slane %v578_v55, 7  ;;  %v599_v21 = vadd.f32 %v578_v55, %v3967_v25  ;;  %v585_v22 = vrot.slane %v578_v55, 2 }
 0x3c9   :  { %v586_v26 = vrot.slane %v578_v55, 3  ;;  %v587_v31 = vrot.slane %v578_v55, 4  ;;  %v588_v34 = vrot.slane %v578_v55, 5  ;;  %v589_v39 = vrot.slane %v578_v55, 6 }
 0x3ca   :  { %v600_v23 = vadd.f32 %v584_v19, %v3975_v36  ;;  %v598_v30 = vadd.f32 %v583_v20, %v3969_v28  ;;  %3352 = vtanh.f32 %v599_v21  ;;  %v601_v32 = vadd.f32 %v585_v22, %v3972_v33 }
 0x3cb   :  { %v602_v37 = vadd.f32 %v586_v26, %v3981_v44  ;;  %v603_v40 = vadd.f32 %v587_v31, %v3978_v41  ;;  %v604_v42 = vadd.f32 %v588_v34, %v3987_v52  ;;  %v605_v45 = vadd.f32 %v589_v39, %v3984_v49 }
 0x3cc   :  { %3354 = vtanh.f32 %v600_v23  ;;  %v2979_v60 = vmul.f32 -1.442695, %v599_v21  ;;  %v2980_v61 = vmul.f32 -1.442695, %v600_v23  ;;  %v2978_v63 = vmul.f32 -1.442695, %v598_v30 }
 0x3cd   :  { %3356 = vtanh.f32 %v598_v30  ;;  %v2981_v29 = vmul.f32 -1.442695, %v601_v32  ;;  %v2982_v35 = vmul.f32 -1.442695, %v602_v37  ;;  %v2983_v38 = vmul.f32 -1.442695, %v603_v40 }
 0x3ce   :  { %3358 = vtanh.f32 %v601_v32  ;;  %v2984_v2 = vmul.f32 -1.442695, %v604_v42  ;;  %v2985_v43 = vmul.f32 -1.442695, %v605_v45 }
 0x3cf   :  { %3360 = vtanh.f32 %v602_v37 }
 0x3d0   :  { %3362 = vtanh.f32 %v603_v40 }
 0x3d1   :  { %3364 = vtanh.f32 %v604_v42 }
 0x3d2   :  { %3366 = vtanh.f32 %v605_v45 }
 0x3d3   :  { %3368 = vpow2.f32 %v2979_v60 }
 0x3d4   :  { %v3353_v46 = vpop.eup %3352  ;;  %3370 = vpow2.f32 %v2980_v61 }
 0x3d5   :  { %704 = vrot.lane.b32.xlu1 %v3353_v46, %s3834_s0  ;;  %3372 = vpow2.f32 %v2978_v63 }
 0x3d6   :  { %v3355_v48 = vpop.eup %3354  ;;  %3374 = vpow2.f32 %v2981_v29 }
 0x3d7   :  { %706 = vrot.lane.b32.xlu0 %v3355_v48, %s3834_s0  ;;  %v3357_v51 = vpop.eup %3356  ;;  %3376 = vpow2.f32 %v2982_v35  ;;  %v671_v35 = vrot.slane %v4032_v62, 7 }
 0x3d8   :  { %v3359_v53 = vpop.eup %3358  ;;  %3378 = vpow2.f32 %v2983_v38  ;;  %v672_v38 = vrot.slane %v4044_v10, 7 }
 0x3d9   :  { %702 = vrot.lane.b32.xlu1 %v3357_v51, %s3834_s0  ;;  %v3361_v54 = vpop.eup %3360  ;;  %3380 = vpow2.f32 %v2984_v2 }
 0x3da   :  { %v3363_v57 = vpop.eup %3362  ;;  %3382 = vpow2.f32 %v2985_v43 }
 0x3db   :  { %708 = vrot.lane.b32.xlu0 %v3359_v53, %s3834_s0  ;;  %v3365_v58 = vpop.eup %3364 }
 0x3dc   :  { %v3367_v59 = vpop.eup %3366 }
 0x3dd   :  { %710 = vrot.lane.b32.xlu1 %v3361_v54, %s3834_s0  ;;  %v3369_v3 = vpop.eup %3368 }
 0x3de   :  { %v3371_v4 = vpop.eup %3370  ;;  %v631_v7 = vadd.f32 1.0, %v3369_v3 }
 0x3df   :  { %712 = vrot.lane.b32.xlu0 %v3363_v57, %s3834_s0  ;;  %v3373_v8 = vpop.eup %3372  ;;  %v632_v11 = vadd.f32 1.0, %v3371_v4  ;;  %v670_v4 = vrot.slane %v4039_v6, 7 }
 0x3e0   :  { %v3375_v47 = vpop.eup %3374  ;;  %3384 = vrcp.f32 %v631_v7  ;;  %v630_v12 = vadd.f32 1.0, %v3373_v8 }
 0x3e1   :  { %714 = vrot.lane.b32.xlu1 %v3365_v58, %s3834_s0  ;;  %v3377_v13 = vpop.eup %3376  ;;  %3386 = vrcp.f32 %v632_v11  ;;  %v633_v50 = vadd.f32 1.0, %v3375_v47  ;;  %v673_v11 = vrot.slane %v4037_v5, 7 }
 0x3e2   :  { %v3379_v16 = vpop.eup %3378  ;;  %3388 = vrcp.f32 %v630_v12  ;;  %v634_v18 = vadd.f32 1.0, %v3377_v13  ;;  %v674_v13 = vrot.slane %v4049_v15, 7 }
 0x3e3   :  { %716 = vrot.lane.b32.xlu0 %v3367_v59, %s3834_s0  ;;  %v3381_v55 = vpop.eup %3380  ;;  %3390 = vrcp.f32 %v633_v50  ;;  %v635_v56 = vadd.f32 1.0, %v3379_v16  ;;  %v675_v16 = vrot.slane %v4051_v17, 7 }
 0x3e4   :  { %v3383_v19 = vpop.eup %3382  ;;  %3392 = vrcp.f32 %v634_v18  ;;  %v636_v20 = vadd.f32 1.0, %v3381_v55 }
 0x3e5   :  { %3394 = vrcp.f32 %v635_v56  ;;  %v637_v21 = vadd.f32 1.0, %v3383_v19  ;;  %v676_v19 = vrot.slane %v4060_v27, 7 }
 0x3e6   :  { %3396 = vrcp.f32 %v636_v20 }
 0x3e7   :  { %3398 = vrcp.f32 %v637_v21  ;;  %v677_v21 = vrot.slane %v4058_v24, 7 }
 0x3ea   :  { %v4110_v22 = vpop.eup %3384 }
 0x3eb   :  { %v4112_v26 = vpop.eup %3386  ;;  %v687_v2 = vmul.f32 %v4110_v22, %v671_v35 }
 0x3ec   :  { %v4117_v34 = vpop.eup %3388  ;;  %v688_v3 = vmul.f32 %v4112_v26, %v672_v38 }
 0x3ed   :  { %v4120_v39 = vpop.eup %3390  ;;  %v686_v62 = vmul.f32 %v4117_v34, %v670_v4 }
 0x3ee   :  { %v4125_v46 = vpop.eup %3392  ;;  %v689_v12 = vmul.f32 %v4120_v39, %v673_v11 }
 0x3ef   :  { %v4128_v51 = vpop.eup %3394  ;;  %v690_v5 = vmul.f32 %v4125_v46, %v674_v13 }
 0x3f0   :  { %v4133_v58 = vpop.eup %3396  ;;  %v691_v56 = vmul.f32 %v4128_v51, %v675_v16 }
 0x3f1   :  { %v4136_v60 = vpop.eup %3398  ;;  %v692_v17 = vmul.f32 %v4133_v58, %v676_v19 }
 0x447   :  { %v705_v23 = vpop.permute.xlu1 %704 }
 0x448   :  { %v727_v30 = vmul.f32 %v4110_v22, %v705_v23 }
 0x449   :  { %v707_v31 = vpop.permute.xlu0 %706 }
 0x44a   :  { %v728_v32 = vmul.f32 %v4112_v26, %v707_v31  ;;  %744 = vrot.lane.b32.xlu1 %v727_v30, %s3835_s3  ;;  %v693_v31 = vmul.f32 %v4136_v60, %v677_v21 }
 0x44b   :  { %v703_v37 = vpop.permute.xlu1 %702 }
 0x44c   :  { %746 = vrot.lane.b32.xlu0 %v728_v32, %s3835_s3  ;;  %v726_v40 = vmul.f32 %v4117_v34, %v703_v37 }
 0x44d   :  { %v709_v42 = vpop.permute.xlu0 %708 }
 0x44e   :  { %v729_v45 = vmul.f32 %v4120_v39, %v709_v42  ;;  %742 = vrot.lane.b32.xlu1 %v726_v40, %s3835_s3 }
 0x44f   :  { %v711_v48 = vpop.permute.xlu1 %710 }
 0x450   :  { %748 = vrot.lane.b32.xlu0 %v729_v45, %s3835_s3  ;;  %v730_v53 = vmul.f32 %v4125_v46, %v711_v48 }
 0x451   :  { %v713_v54 = vpop.permute.xlu0 %712 }
 0x452   :  { %v731_v57 = vmul.f32 %v4128_v51, %v713_v54  ;;  %750 = vrot.lane.b32.xlu1 %v730_v53, %s3835_s3 }
 0x453   :  { %v715_v59 = vpop.permute.xlu1 %714 }
 0x454   :  { %752 = vrot.lane.b32.xlu0 %v731_v57, %s3835_s3  ;;  %v732_v61 = vmul.f32 %v4133_v58, %v715_v59 }
 0x455   :  { %v717_v63 = vpop.permute.xlu0 %716 }
 0x456   :  { %v733_v29 = vmul.f32 %v4136_v60, %v717_v63  ;;  %754 = vrot.lane.b32.xlu1 %v732_v61, %s3835_s3 }
 0x458   :  { %756 = vrot.lane.b32.xlu0 %v733_v29, %s3835_s3 }
 0x4bc   :  { %v745_v43 = vpop.permute.xlu1 %744 }
 0x4bd   :  { %v4147_v7 = vadd.f32 %v745_v43, %v687_v2 }
 0x4be   :  { %v747_v8 = vpop.permute.xlu0 %746 }
 0x4bf   :  { %v4150_v47 = vadd.f32 %v747_v8, %v688_v3  ;;  %3400 = vtanh.f32 %v4147_v7 }
 0x4c0   :  { %v743_v10 = vpop.permute.xlu1 %742 }
 0x4c1   :  { %3402 = vtanh.f32 %v4150_v47  ;;  %v4157_v50 = vadd.f32 %v743_v10, %v686_v62 }
 0x4c2   :  { %v749_v6 = vpop.permute.xlu0 %748 }
 0x4c3   :  { %v4160_v18 = vadd.f32 %v749_v6, %v689_v12  ;;  %3404 = vtanh.f32 %v4157_v50 }
 0x4c4   :  { %v751_v55 = vpop.permute.xlu1 %750 }
 0x4c5   :  { %3406 = vtanh.f32 %v4160_v18  ;;  %v4167_v20 = vadd.f32 %v751_v55, %v690_v5 }
 0x4c6   :  { %v753_v15 = vpop.permute.xlu0 %752 }
 0x4c7   :  { %v4170_v23 = vadd.f32 %v753_v15, %v691_v56  ;;  %3408 = vtanh.f32 %v4167_v20 }
 0x4c8   :  { %v755_v30 = vpop.permute.xlu1 %754 }
 0x4c9   :  { %3410 = vtanh.f32 %v4170_v23  ;;  %v3401_v32 = vpop.eup %3400  ;;  %v4176_v37 = vadd.f32 %v755_v30, %v692_v17 }
 0x4ca   :  { %v757_v27 = vpop.permute.xlu0 %756  ;;  %792 = vrot.lane.b32.xlu1 %v3401_v32, %s3834_s0 }
 0x4cb   :  { %v3403_v40 = vpop.eup %3402  ;;  %v4178_v42 = vadd.f32 %v757_v27, %v693_v31  ;;  %3412 = vtanh.f32 %v4176_v37 }
 0x4cc   :  { %794 = vrot.lane.b32.xlu0 %v3403_v40, %s3834_s0 }
 0x4cd   :  { %3414 = vtanh.f32 %v4178_v42  ;;  %v3405_v24 = vpop.eup %3404 }
 0x4ce   :  { %790 = vrot.lane.b32.xlu1 %v3405_v24, %s3834_s0 }
 0x4cf   :  { %v3407_v45 = vpop.eup %3406 }
 0x4d0   :  { %796 = vrot.lane.b32.xlu0 %v3407_v45, %s3834_s0 }
 0x4d1   :  { %v3409_v48 = vpop.eup %3408 }
 0x4d2   :  { %798 = vrot.lane.b32.xlu1 %v3409_v48, %s3834_s0 }
 0x4d3   :  { %v3411_v53 = vpop.eup %3410 }
 0x4d4   :  { %800 = vrot.lane.b32.xlu0 %v3411_v53, %s3834_s0 }
 0x4d5   :  { %v3413_v54 = vpop.eup %3412 }
 0x4d6   :  { %802 = vrot.lane.b32.xlu1 %v3413_v54, %s3834_s0 }
 0x4d7   :  { %v3415_v57 = vpop.eup %3414 }
 0x4d8   :  { %804 = vrot.lane.b32.xlu0 %v3415_v57, %s3834_s0 }
 0x53c   :  { %v793_v59 = vpop.permute.xlu1 %792 }
 0x53d   :  { %v815_v43 = vmul.f32 %v4110_v22, %v793_v59 }
 0x53e   :  { %v795_v61 = vpop.permute.xlu0 %794 }
 0x53f   :  { %v816_v63 = vmul.f32 %v4112_v26, %v795_v61 }
 0x540   :  { %v791_v29 = vpop.permute.xlu1 %790 }
 0x541   :  { %v814_v35 = vmul.f32 %v4117_v34, %v791_v29  ;;  %v832_v4 = vrot.slane %v816_v63, 7 }
 0x542   :  { %v797_v38 = vpop.permute.xlu0 %796 }
 0x543   :  { %v817_v2 = vmul.f32 %v4120_v39, %v797_v38  ;;  %v830_v3 = vrot.slane %v814_v35, 1 }
 0x544   :  { %v799_v11 = vpop.permute.xlu1 %798 }
 0x545   :  { %v834_v8 = vrot.slane %v817_v2, 6  ;;  %v831_v62 = vsel %vm488_vm2, %v815_v43, %v830_v3  ;;  %v818_v10 = vmul.f32 %v4125_v46, %v799_v11 }
 0x546   :  { %v801_v12 = vpop.permute.xlu0 %800  ;;  %v833_v13 = vsel %vm491_vm3, %v832_v4, %v831_v62 }
 0x547   :  { %v819_v26 = vmul.f32 %v4128_v51, %v801_v12  ;;  %v835_v34 = vsel %vm494_vm4, %v834_v8, %v833_v13  ;;  %v836_v6 = vrot.slane %v818_v10, 5 }
 0x548   :  { %v803_v39 = vpop.permute.xlu1 %802 }
 0x549   :  { %v838_v16 = vrot.slane %v819_v26, 4  ;;  %v837_v22 = vsel %vm497_vm5, %v836_v6, %v835_v34  ;;  %v820_v5 = vmul.f32 %v4133_v58, %v803_v39 }
 0x54a   :  { %v805_v55 = vpop.permute.xlu0 %804 }
 0x54b   :  { %v821_v56 = vmul.f32 %v4136_v60, %v805_v55  ;;  %v839_v19 = vsel %vm500_vm6, %v838_v16, %v837_v22  ;;  %v840_v46 = vrot.slane %v820_v5, 3 }
 0x54d   :  { %v842_v15 = vrot.slane %v821_v56, 2  ;;  %v841_v21 = vsel %vm503_vm7, %v840_v46, %v839_v19 }
 0x54f   :  { %v843_v51 = vsel %vm506_vm8, %v842_v15, %v841_v21 }
 0x550   :  { %844 = vrot.lane.b32.xlu1 %v843_v51, %s3835_s3 }
 0x5c2   :  { %v845_v17 = vpop.permute.xlu1 %844 }
 0x5c3   :  { %3150 = vmatmul.mubr.msk.f32.vlgmr.msra.gmra.mrb[8].mxu0 %vm60_vm1, %v845_v17 }
 0x5c4   :  { %3252 = vmatpush3.bf16.msra.mxu0 %v3904_v9  ;;  %3171 = vmatprep.mubr.msk.f32.mxu0 %vm3832_vm0, %v3833_v1 }
 0x5c5   :  { %3253 = vmatprep.subr.bf16.mxu0 %v3831_v0 }
 0x5c8   :  { %3255 = vmatpush3.bf16.msra.mxu0 %v3917_v14 }
 0x5c9   :  { %3262 = vmatprep.subr.bf16.mxu0 %v3831_v0 }
 0x696   :  { %v914_v58 = vpop.f32.mrb[8].mxu0 }
 0x697   :  { %v919_v60 = vrot.slane %v914_v58, 6  ;;  %v3151_v30 = vpop.f32.mrb[9].mxu0  ;;  %v921_v32 = vrot.slane %v914_v58, 1  ;;  %v920_v27 = vrot.slane %v914_v58, 7  ;;  %v936_v40 = vadd.f32 %v914_v58, %v3975_v36 }
 0x698   :  { %v922_v24 = vrot.slane %v914_v58, 2  ;;  %v923_v53 = vrot.slane %v914_v58, 3  ;;  %v924_v57 = vrot.slane %v914_v58, 4  ;;  %v925_v61 = vrot.slane %v914_v58, 5 }
 0x699   :  { %v934_v31 = vadd.f32 %v919_v60, %v3969_v28  ;;  %v937_v45 = vadd.f32 %v921_v32, %v3972_v33  ;;  %v935_v54 = vadd.f32 %v920_v27, %v3967_v25  ;;  %v2989_v10 = vmul.f32 -1.442695, %v936_v40 }
 0x69a   :  { %v938_v59 = vadd.f32 %v922_v24, %v3981_v44  ;;  %v939_v63 = vadd.f32 %v923_v53, %v3978_v41  ;;  %v940_v29 = vadd.f32 %v924_v57, %v3987_v52  ;;  %v941_v35 = vadd.f32 %v925_v61, %v3984_v49 }
 0x69b   :  { %3416 = vtanh.f32 %v934_v31  ;;  %v2987_v62 = vmul.f32 -1.442695, %v934_v31  ;;  %v2990_v12 = vmul.f32 -1.442695, %v937_v45  ;;  %v2988_v26 = vmul.f32 -1.442695, %v935_v54 }
 0x69c   :  { %3418 = vtanh.f32 %v936_v40  ;;  %v2991_v34 = vmul.f32 -1.442695, %v938_v59  ;;  %v2992_v16 = vmul.f32 -1.442695, %v939_v63  ;;  %v2993_v39 = vmul.f32 -1.442695, %v940_v29 }
 0x69d   :  { %3420 = vtanh.f32 %v937_v45  ;;  %v2994_v22 = vmul.f32 -1.442695, %v941_v35 }
 0x69e   :  { %3422 = vtanh.f32 %v935_v54 }
 0x69f   :  { %3424 = vtanh.f32 %v938_v59 }
 0x6a0   :  { %3426 = vtanh.f32 %v939_v63 }
 0x6a1   :  { %3428 = vtanh.f32 %v940_v29 }
 0x6a2   :  { %3430 = vtanh.f32 %v941_v35 }
 0x6a3   :  { %3432 = vpow2.f32 %v2987_v62 }
 0x6a4   :  { %3434 = vpow2.f32 %v2989_v10 }
 0x6a5   :  { %v3417_v48 = vpop.eup %3416  ;;  %3436 = vpow2.f32 %v2990_v12 }
 0x6a6   :  { %1038 = vrot.lane.b32.xlu0 %v3417_v48, %s3834_s0  ;;  %v3419_v38 = vpop.eup %3418  ;;  %3438 = vpow2.f32 %v2988_v26  ;;  %v1006_v26 = vrot.slane %v4157_v50, 7 }
 0x6a7   :  { %v3421_v2 = vpop.eup %3420  ;;  %1042 = vrot.lane.b32.xlu1 %v3419_v38, %s3834_s0  ;;  %3440 = vpow2.f32 %v2991_v34 }
 0x6a8   :  { %v3423_v43 = vpop.eup %3422 }
 0x6a9   :  { %v3425_v3 = vpop.eup %3424 }
 0x6aa   :  { %1044 = vrot.lane.b32.xlu0 %v3421_v2, %s3834_s0  ;;  %v3427_v4 = vpop.eup %3426 }
 0x6ab   :  { %1040 = vrot.lane.b32.xlu1 %v3423_v43, %s3834_s0  ;;  %v3429_v8 = vpop.eup %3428 }
 0x6ac   :  { %v3431_v11 = vpop.eup %3430 }
 0x6ad   :  { %v3433_v13 = vpop.eup %3432 }
 0x6ae   :  { %1046 = vrot.lane.b32.xlu0 %v3425_v3, %s3834_s0  ;;  %v966_v6 = vadd.f32 1.0, %v3433_v13  ;;  %v3435_v5 = vpop.eup %3434 }
 0x6af   :  { %1048 = vrot.lane.b32.xlu1 %v3427_v4, %s3834_s0  ;;  %v3437_v55 = vpop.eup %3436  ;;  %v968_v56 = vadd.f32 1.0, %v3435_v5 }
 0x6b0   :  { %3442 = vrcp.f32 %v966_v6  ;;  %v3439_v19 = vpop.eup %3438  ;;  %v969_v46 = vadd.f32 1.0, %v3437_v55 }
 0x6b1   :  { %3444 = vpow2.f32 %v2992_v16  ;;  %v3441_v15 = vpop.eup %3440  ;;  %v967_v17 = vadd.f32 1.0, %v3439_v19  ;;  %v1007_v19 = vrot.slane %v4147_v7, 7  ;;  %v1011_v7 = vrot.slane %v4170_v23, 7 }
 0x6b2   :  { %1050 = vrot.lane.b32.xlu0 %v3429_v8, %s3834_s0  ;;  %3446 = vpow2.f32 %v2993_v39  ;;  %v970_v30 = vadd.f32 1.0, %v3441_v15  ;;  %v1008_v39 = vrot.slane %v4150_v47, 7  ;;  %v1010_v15 = vrot.slane %v4167_v20, 7 }
 0x6b3   :  { %1052 = vrot.lane.b32.xlu1 %v3431_v11, %s3834_s0  ;;  %3448 = vpow2.f32 %v2994_v22  ;;  %v1009_v22 = vrot.slane %v4160_v18, 7  ;;  %v1012_v20 = vrot.slane %v4176_v37, 7 }
 0x6b4   :  { %3450 = vrcp.f32 %v968_v56 }
 0x6b5   :  { %3452 = vrcp.f32 %v969_v46 }
 0x6b6   :  { %3454 = vrcp.f32 %v967_v17 }
 0x6b7   :  { %3456 = vrcp.f32 %v970_v30 }
 0x6ba   :  { %v4229_v21 = vpop.eup %3442 }
 0x6bb   :  { %v3445_v58 = vpop.eup %3444  ;;  %v1022_v34 = vmul.f32 %v4229_v21, %v1006_v26 }
 0x6bc   :  { %v3447_v31 = vpop.eup %3446  ;;  %v971_v32 = vadd.f32 1.0, %v3445_v58 }
 0x6bd   :  { %v3449_v27 = vpop.eup %3448  ;;  %v972_v40 = vadd.f32 1.0, %v3447_v31 }
 0x6be   :  { %3458 = vrcp.f32 %v971_v32  ;;  %v973_v24 = vadd.f32 1.0, %v3449_v27  ;;  %v4233_v45 = vpop.eup %3450 }
 0x6bf   :  { %3460 = vrcp.f32 %v972_v40  ;;  %v4235_v53 = vpop.eup %3452  ;;  %v1024_v5 = vmul.f32 %v4233_v45, %v1008_v39 }
 0x6c0   :  { %3462 = vrcp.f32 %v973_v24  ;;  %v4240_v61 = vpop.eup %3454  ;;  %v1025_v56 = vmul.f32 %v4235_v53, %v1009_v22  ;;  %v1013_v24 = vrot.slane %v4178_v42, 7 }
 0x6c1   :  { %v4243_v29 = vpop.eup %3456  ;;  %v1023_v47 = vmul.f32 %v4240_v61, %v1007_v19 }
 0x6c2   :  { %v1026_v58 = vmul.f32 %v4243_v29, %v1010_v15 }
 0x6c8   :  { %v4248_v43 = vpop.eup %3458 }
 0x6c9   :  { %v4251_v4 = vpop.eup %3460  ;;  %v1027_v32 = vmul.f32 %v4248_v43, %v1011_v7 }
 0x6ca   :  { %v4256_v10 = vpop.eup %3462  ;;  %v1028_v40 = vmul.f32 %v4251_v4, %v1012_v20 }
 0x6cb   :  { %v1029_v37 = vmul.f32 %v4256_v10, %v1013_v24 }
 0x718   :  { %v1039_v51 = vpop.permute.xlu0 %1038 }
 0x719   :  { %v1062_v60 = vmul.f32 %v4229_v21, %v1039_v51  ;;  %v1043_v48 = vpop.permute.xlu1 %1042 }
 0x71a   :  { %v1064_v54 = vmul.f32 %v4233_v45, %v1043_v48 }
 0x71b   :  { %1078 = vrot.lane.b32.xlu0 %v1062_v60, %s3835_s3 }
 0x71c   :  { %v1045_v57 = vpop.permute.xlu0 %1044  ;;  %1082 = vrot.lane.b32.xlu1 %v1064_v54, %s3835_s3 }
 0x71d   :  { %v1065_v59 = vmul.f32 %v4235_v53, %v1045_v57  ;;  %v1041_v63 = vpop.permute.xlu1 %1040 }
 0x71e   :  { %v1063_v35 = vmul.f32 %v4240_v61, %v1041_v63 }
 0x71f   :  { %1084 = vrot.lane.b32.xlu0 %v1065_v59, %s3835_s3 }
 0x720   :  { %v1047_v38 = vpop.permute.xlu0 %1046  ;;  %1080 = vrot.lane.b32.xlu1 %v1063_v35, %s3835_s3 }
 0x721   :  { %v1066_v2 = vmul.f32 %v4243_v29, %v1047_v38  ;;  %v1049_v3 = vpop.permute.xlu1 %1048 }
 0x722   :  { %v1067_v8 = vmul.f32 %v4248_v43, %v1049_v3 }
 0x723   :  { %1086 = vrot.lane.b32.xlu0 %v1066_v2, %s3835_s3 }
 0x724   :  { %v1051_v11 = vpop.permute.xlu0 %1050  ;;  %1088 = vrot.lane.b32.xlu1 %v1067_v8, %s3835_s3 }
 0x725   :  { %v1068_v62 = vmul.f32 %v4251_v4, %v1051_v11  ;;  %v1053_v12 = vpop.permute.xlu1 %1052 }
 0x726   :  { %v1069_v13 = vmul.f32 %v4256_v10, %v1053_v12 }
 0x727   :  { %1090 = vrot.lane.b32.xlu0 %v1068_v62, %s3835_s3 }
 0x728   :  { %1092 = vrot.lane.b32.xlu1 %v1069_v13, %s3835_s3 }
 0x78d   :  { %v1079_v6 = vpop.permute.xlu0 %1078 }
 0x78e   :  { %v4263_v16 = vadd.f32 %v1079_v6, %v1022_v34  ;;  %v1083_v55 = vpop.permute.xlu1 %1082 }
 0x78f   :  { %v4271_v46 = vadd.f32 %v1083_v55, %v1024_v5 }
 0x790   :  { %3464 = vtanh.f32 %v4263_v16 }
 0x791   :  { %v1085_v50 = vpop.permute.xlu0 %1084  ;;  %3466 = vtanh.f32 %v4271_v46 }
 0x792   :  { %v4274_v51 = vadd.f32 %v1085_v50, %v1025_v56  ;;  %v1081_v18 = vpop.permute.xlu1 %1080 }
 0x793   :  { %v4282_v60 = vadd.f32 %v1081_v18, %v1023_v47 }
 0x794   :  { %3468 = vtanh.f32 %v4274_v51 }
 0x795   :  { %v1087_v30 = vpop.permute.xlu0 %1086  ;;  %3470 = vtanh.f32 %v4282_v60 }
 0x796   :  { %v4285_v31 = vadd.f32 %v1087_v30, %v1026_v58  ;;  %v1089_v27 = vpop.permute.xlu1 %1088 }
 0x797   :  { %v4292_v48 = vadd.f32 %v1089_v27, %v1027_v32 }
 0x798   :  { %3472 = vtanh.f32 %v4285_v31 }
 0x799   :  { %v1091_v23 = vpop.permute.xlu0 %1090  ;;  %3474 = vtanh.f32 %v4292_v48 }
 0x79a   :  { %v3465_v17 = vpop.eup %3464  ;;  %v4294_v54 = vadd.f32 %v1091_v23, %v1028_v40  ;;  %v1093_v57 = vpop.permute.xlu1 %1092 }
 0x79b   :  { %1126 = vrot.lane.b32.xlu0 %v3465_v17, %s3834_s0  ;;  %v3467_v59 = vpop.eup %3466  ;;  %v4299_v63 = vadd.f32 %v1093_v57, %v1029_v37 }
 0x79c   :  { %3476 = vtanh.f32 %v4294_v54  ;;  %1130 = vrot.lane.b32.xlu1 %v3467_v59, %s3834_s0 }
 0x79d   :  { %3478 = vtanh.f32 %v4299_v63 }
 0x79e   :  { %v3469_v35 = vpop.eup %3468 }
 0x79f   :  { %1132 = vrot.lane.b32.xlu0 %v3469_v35, %s3834_s0  ;;  %v3471_v42 = vpop.eup %3470 }
 0x7a0   :  { %1128 = vrot.lane.b32.xlu1 %v3471_v42, %s3834_s0 }
 0x7a2   :  { %v3473_v38 = vpop.eup %3472 }
 0x7a3   :  { %1134 = vrot.lane.b32.xlu0 %v3473_v38, %s3834_s0  ;;  %v3475_v2 = vpop.eup %3474 }
 0x7a4   :  { %1136 = vrot.lane.b32.xlu1 %v3475_v2, %s3834_s0 }
 0x7a6   :  { %v3477_v3 = vpop.eup %3476 }
 0x7a7   :  { %1138 = vrot.lane.b32.xlu0 %v3477_v3, %s3834_s0  ;;  %v3479_v8 = vpop.eup %3478 }
 0x7a8   :  { %1140 = vrot.lane.b32.xlu1 %v3479_v8, %s3834_s0 }
 0x80d   :  { %v1127_v11 = vpop.permute.xlu0 %1126 }
 0x80e   :  { %v1131_v62 = vpop.permute.xlu1 %1130  ;;  %v1150_v13 = vmul.f32 %v4229_v21, %v1127_v11 }
 0x80f   :  { %v1152_v19 = vmul.f32 %v4233_v45, %v1131_v62 }
 0x810   :  { %v1166_v5 = vrot.slane %v1150_v13, 2 }
 0x811   :  { %v1133_v12 = vpop.permute.xlu0 %1132 }
 0x812   :  { %v1153_v26 = vmul.f32 %v4235_v53, %v1133_v12  ;;  %v1129_v34 = vpop.permute.xlu1 %1128 }
 0x813   :  { %v1151_v6 = vmul.f32 %v4240_v61, %v1129_v34 }
 0x814   :  { %v1170_v56 = vrot.slane %v1153_v26, 7 }
 0x815   :  { %v1135_v39 = vpop.permute.xlu0 %1134  ;;  %v1167_v55 = vrot.slane %v1151_v6, 1 }
 0x816   :  { %v1154_v22 = vmul.f32 %v4243_v29, %v1135_v39  ;;  %v1137_v50 = vpop.permute.xlu1 %1136 }
 0x817   :  { %v1168_v17 = vsel %vm488_vm2, %v1167_v55, %v1166_v5  ;;  %v1155_v47 = vmul.f32 %v4248_v43, %v1137_v50 }
 0x818   :  { %v1172_v15 = vrot.slane %v1154_v22, 6  ;;  %v1169_v53 = vsel %vm491_vm3, %v1152_v19, %v1168_v17 }
 0x819   :  { %v1139_v21 = vpop.permute.xlu0 %1138  ;;  %v1171_v61 = vsel %vm494_vm4, %v1170_v56, %v1169_v53  ;;  %v1174_v58 = vrot.slane %v1155_v47, 5 }
 0x81a   :  { %v1156_v18 = vmul.f32 %v4251_v4, %v1139_v21  ;;  %v1173_v29 = vsel %vm497_vm5, %v1172_v15, %v1171_v61  ;;  %v1141_v7 = vpop.permute.xlu1 %1140 }
 0x81b   :  { %v1157_v45 = vmul.f32 %v4256_v10, %v1141_v7  ;;  %v1175_v20 = vsel %vm500_vm6, %v1174_v58, %v1173_v29 }
 0x81c   :  { %v1176_v30 = vrot.slane %v1156_v18, 4 }
 0x81d   :  { %v1178_v27 = vrot.slane %v1157_v45, 3 }
 0x81e   :  { %v1177_v32 = vsel %vm503_vm7, %v1176_v30, %v1175_v20 }
 0x81f   :  { %v1179_v43 = vsel %vm506_vm8, %v1178_v27, %v1177_v32 }
 0x820   :  { %1180 = vrot.lane.b32.xlu0 %v1179_v43, %s3835_s3 }
 0x892   :  { %v1181_v40 = vpop.permute.xlu0 %1180 }
 0x893   :  { %3161 = vmatmul.mubr.msk.f32.vlgmr.msra.gmra.mrb[4].mxu1 %vm60_vm1, %v1181_v40 }
 0x894   :  { %3258 = vmatpush3.bf16.msra.mxu1 %v3904_v9  ;;  %3182 = vmatprep.mubr.msk.f32.mxu1 %vm3832_vm0, %v3833_v1 }
 0x895   :  { %3259 = vmatprep.subr.bf16.mxu1 %v3831_v0 }
 0x898   :  { %3261 = vmatpush3.bf16.msra.mxu1 %v3917_v14 }
 0x899   :  { %3268 = vmatprep.subr.bf16.mxu1 %v3831_v0 }
 0x966   :  { %v1250_v4 = vpop.f32.mrb[4].mxu1 }
 0x967   :  { %v3162_v10 = vpop.f32.mrb[5].mxu1  ;;  %v1256_v24 = vrot.slane %v1250_v4, 6  ;;  %v1258_v23 = vrot.slane %v1250_v4, 1  ;;  %v1255_v57 = vrot.slane %v1250_v4, 5  ;;  %v1273_v59 = vadd.f32 %v1250_v4, %v3972_v33 }
 0x968   :  { %v1259_v35 = vrot.slane %v1250_v4, 2  ;;  %v1257_v38 = vrot.slane %v1250_v4, 7  ;;  %v1261_v3 = vrot.slane %v1250_v4, 4  ;;  %v1260_v11 = vrot.slane %v1250_v4, 3 }
 0x969   :  { %v1271_v37 = vadd.f32 %v1256_v24, %v3967_v25  ;;  %v1274_v42 = vadd.f32 %v1258_v23, %v3981_v44  ;;  %v1270_v2 = vadd.f32 %v1255_v57, %v3969_v28  ;;  %v2999_v50 = vmul.f32 -1.442695, %v1273_v59 }
 0x96a   :  { %v1275_v8 = vadd.f32 %v1259_v35, %v3978_v41  ;;  %v1272_v62 = vadd.f32 %v1257_v38, %v3975_v36  ;;  %v1277_v12 = vadd.f32 %v1261_v3, %v3984_v49  ;;  %v1276_v26 = vadd.f32 %v1260_v11, %v3987_v52 }
 0x96b   :  { %3480 = vtanh.f32 %v1271_v37  ;;  %v2997_v19 = vmul.f32 -1.442695, %v1271_v37  ;;  %v3000_v15 = vmul.f32 -1.442695, %v1274_v42  ;;  %v2996_v17 = vmul.f32 -1.442695, %v1270_v2 }
 0x96c   :  { %3482 = vtanh.f32 %v1273_v59  ;;  %v3001_v47 = vmul.f32 -1.442695, %v1275_v8  ;;  %v2998_v21 = vmul.f32 -1.442695, %v1272_v62  ;;  %v3003_v53 = vmul.f32 -1.442695, %v1277_v12 }
 0x96d   :  { %3484 = vtanh.f32 %v1274_v42  ;;  %v3002_v61 = vmul.f32 -1.442695, %v1276_v26 }
 0x96e   :  { %3486 = vtanh.f32 %v1270_v2 }
 0x96f   :  { %3488 = vtanh.f32 %v1275_v8 }
 0x970   :  { %3490 = vtanh.f32 %v1272_v62 }
 0x971   :  { %3492 = vtanh.f32 %v1277_v12 }
 0x972   :  { %3494 = vtanh.f32 %v1276_v26 }
 0x973   :  { %3496 = vpow2.f32 %v2997_v19 }
 0x974   :  { %3498 = vpow2.f32 %v2999_v50 }
 0x975   :  { %v3481_v13 = vpop.eup %3480  ;;  %3500 = vpow2.f32 %v3000_v15 }
 0x976   :  { %1376 = vrot.lane.b32.xlu0 %v3481_v13, %s3834_s0  ;;  %v3483_v34 = vpop.eup %3482  ;;  %3502 = vpow2.f32 %v2996_v17 }
 0x977   :  { %1380 = vrot.lane.b32.xlu1 %v3483_v34, %s3834_s0  ;;  %v3485_v6 = vpop.eup %3484  ;;  %3504 = vpow2.f32 %v3001_v47  ;;  %v1343_v47 = vrot.slane %v4282_v60, 7 }
 0x978   :  { %v3487_v39 = vpop.eup %3486  ;;  %3506 = vpow2.f32 %v2998_v21  ;;  %v1345_v21 = vrot.slane %v4274_v51, 7  ;;  %v1347_v51 = vrot.slane %v4292_v48, 7 }
 0x979   :  { %v3489_v22 = vpop.eup %3488  ;;  %3508 = vpow2.f32 %v3003_v53 }
 0x97a   :  { %1382 = vrot.lane.b32.xlu0 %v3485_v6, %s3834_s0  ;;  %v3491_v5 = vpop.eup %3490  ;;  %3510 = vpow2.f32 %v3002_v61  ;;  %v1346_v61 = vrot.slane %v4285_v31, 7 }
 0x97b   :  { %1374 = vrot.lane.b32.xlu1 %v3487_v39, %s3834_s0  ;;  %v3493_v55 = vpop.eup %3492 }
 0x97c   :  { %v3495_v56 = vpop.eup %3494 }
 0x97d   :  { %v3497_v18 = vpop.eup %3496 }
 0x97e   :  { %1384 = vrot.lane.b32.xlu0 %v3489_v22, %s3834_s0  ;;  %v3499_v58 = vpop.eup %3498  ;;  %v1303_v29 = vadd.f32 1.0, %v3497_v18 }
 0x97f   :  { %1378 = vrot.lane.b32.xlu1 %v3491_v5, %s3834_s0  ;;  %v3501_v7 = vpop.eup %3500  ;;  %v1305_v30 = vadd.f32 1.0, %v3499_v58 }
 0x980   :  { %v3503_v45 = vpop.eup %3502  ;;  %3512 = vrcp.f32 %v1303_v29  ;;  %v1306_v20 = vadd.f32 1.0, %v3501_v7 }
 0x981   :  { %v3505_v32 = vpop.eup %3504  ;;  %3514 = vrcp.f32 %v1305_v30  ;;  %v1302_v27 = vadd.f32 1.0, %v3503_v45  ;;  %v1342_v30 = vrot.slane %v4263_v16, 7 }
 0x982   :  { %1388 = vrot.lane.b32.xlu0 %v3493_v55, %s3834_s0  ;;  %v3507_v43 = vpop.eup %3506  ;;  %3516 = vrcp.f32 %v1306_v20  ;;  %v1307_v40 = vadd.f32 1.0, %v3505_v32 }
 0x983   :  { %1386 = vrot.lane.b32.xlu1 %v3495_v56, %s3834_s0  ;;  %v3509_v4 = vpop.eup %3508  ;;  %3518 = vrcp.f32 %v1302_v27  ;;  %v1304_v10 = vadd.f32 1.0, %v3507_v43  ;;  %v1344_v43 = vrot.slane %v4271_v46, 7 }
 0x984   :  { %v3511_v24 = vpop.eup %3510  ;;  %3520 = vrcp.f32 %v1307_v40  ;;  %v1309_v23 = vadd.f32 1.0, %v3509_v4 }
 0x985   :  { %3522 = vrcp.f32 %v1304_v10  ;;  %v1308_v59 = vadd.f32 1.0, %v3511_v24  ;;  %v1349_v10 = vrot.slane %v4299_v63, 7 }
 0x986   :  { %3524 = vrcp.f32 %v1309_v23 }
 0x987   :  { %3526 = vrcp.f32 %v1308_v59 }
 0x98a   :  { %v4348_v37 = vpop.eup %3512 }
 0x98b   :  { %v4351_v42 = vpop.eup %3514  ;;  %v1359_v53 = vmul.f32 %v4348_v37, %v1343_v47 }
 0x98c   :  { %v4355_v3 = vpop.eup %3516  ;;  %v1361_v58 = vmul.f32 %v4351_v42, %v1345_v21 }
 0x98d   :  { %v4359_v62 = vpop.eup %3518  ;;  %v1362_v60 = vmul.f32 %v4355_v3, %v1346_v61 }
 0x98e   :  { %v4363_v26 = vpop.eup %3520  ;;  %v1358_v31 = vmul.f32 %v4359_v62, %v1342_v30 }
 0x98f   :  { %v4367_v39 = vpop.eup %3522  ;;  %v1363_v16 = vmul.f32 %v4363_v26, %v1347_v51 }
 0x990   :  { %v4371_v55 = vpop.eup %3524  ;;  %v1360_v48 = vmul.f32 %v4367_v39, %v1344_v43 }
 0x991   :  { %v4375_v50 = vpop.eup %3526  ;;  %v1365_v46 = vmul.f32 %v4371_v55, %v1349_v10 }
 0x9e8   :  { %v1377_v57 = vpop.permute.xlu0 %1376 }
 0x9e9   :  { %v1399_v35 = vmul.f32 %v4348_v37, %v1377_v57  ;;  %v1381_v38 = vpop.permute.xlu1 %1380  ;;  %v1348_v57 = vrot.slane %v4294_v54, 7 }
 0x9ea   :  { %v1401_v2 = vmul.f32 %v4351_v42, %v1381_v38 }
 0x9eb   :  { %1416 = vrot.lane.b32.xlu0 %v1399_v35, %s3835_s3  ;;  %v1364_v63 = vmul.f32 %v4375_v50, %v1348_v57 }
 0x9ec   :  { %v1383_v8 = vpop.permute.xlu0 %1382  ;;  %1420 = vrot.lane.b32.xlu1 %v1401_v2, %s3835_s3 }
 0x9ed   :  { %v1402_v11 = vmul.f32 %v4355_v3, %v1383_v8  ;;  %v1375_v12 = vpop.permute.xlu1 %1374 }
 0x9ee   :  { %v1398_v13 = vmul.f32 %v4359_v62, %v1375_v12 }
 0x9ef   :  { %1422 = vrot.lane.b32.xlu0 %v1402_v11, %s3835_s3 }
 0x9f0   :  { %v1385_v34 = vpop.permute.xlu0 %1384  ;;  %1414 = vrot.lane.b32.xlu1 %v1398_v13, %s3835_s3 }
 0x9f1   :  { %v1403_v6 = vmul.f32 %v4363_v26, %v1385_v34  ;;  %v1379_v22 = vpop.permute.xlu1 %1378 }
 0x9f2   :  { %v1400_v5 = vmul.f32 %v4367_v39, %v1379_v22 }
 0x9f3   :  { %1424 = vrot.lane.b32.xlu0 %v1403_v6, %s3835_s3 }
 0x9f4   :  { %v1389_v56 = vpop.permute.xlu0 %1388  ;;  %1418 = vrot.lane.b32.xlu1 %v1400_v5, %s3835_s3 }
 0x9f5   :  { %v1405_v19 = vmul.f32 %v4371_v55, %v1389_v56  ;;  %v1387_v15 = vpop.permute.xlu1 %1386 }
 0x9f6   :  { %v1404_v17 = vmul.f32 %v4375_v50, %v1387_v15 }
 0x9f7   :  { %1428 = vrot.lane.b32.xlu0 %v1405_v19, %s3835_s3 }
 0x9f8   :  { %1426 = vrot.lane.b32.xlu1 %v1404_v17, %s3835_s3 }
 0xa5d   :  { %v1417_v18 = vpop.permute.xlu0 %1416 }
 0xa5e   :  { %v4385_v29 = vadd.f32 %v1417_v18, %v1359_v53  ;;  %v1421_v7 = vpop.permute.xlu1 %1420 }
 0xa5f   :  { %v4388_v45 = vadd.f32 %v1421_v7, %v1361_v58 }
 0xa60   :  { %3528 = vtanh.f32 %v4385_v29 }
 0xa61   :  { %v1423_v20 = vpop.permute.xlu0 %1422  ;;  %3530 = vtanh.f32 %v4388_v45 }
 0xa62   :  { %v4395_v32 = vadd.f32 %v1423_v20, %v1362_v60  ;;  %v1415_v27 = vpop.permute.xlu1 %1414 }
 0xa63   :  { %v4398_v40 = vadd.f32 %v1415_v27, %v1358_v31 }
 0xa64   :  { %3532 = vtanh.f32 %v4395_v32 }
 0xa65   :  { %v1425_v4 = vpop.permute.xlu0 %1424  ;;  %3534 = vtanh.f32 %v4398_v40 }
 0xa66   :  { %v4405_v24 = vadd.f32 %v1425_v4, %v1363_v16  ;;  %v1419_v23 = vpop.permute.xlu1 %1418 }
 0xa67   :  { %v4408_v59 = vadd.f32 %v1419_v23, %v1360_v48 }
 0xa68   :  { %3536 = vtanh.f32 %v4405_v24 }
 0xa69   :  { %v1429_v35 = vpop.permute.xlu0 %1428  ;;  %3538 = vtanh.f32 %v4408_v59 }
 0xa6a   :  { %v3529_v38 = vpop.eup %3528  ;;  %v4414_v2 = vadd.f32 %v1429_v35, %v1365_v46  ;;  %v1427_v8 = vpop.permute.xlu1 %1426 }
 0xa6b   :  { %1464 = vrot.lane.b32.xlu0 %v3529_v38, %s3834_s0  ;;  %v3531_v11 = vpop.eup %3530  ;;  %v4417_v12 = vadd.f32 %v1427_v8, %v1364_v63 }
 0xa6c   :  { %3540 = vtanh.f32 %v4414_v2  ;;  %1468 = vrot.lane.b32.xlu1 %v3531_v11, %s3834_s0 }
 0xa6d   :  { %3542 = vtanh.f32 %v4417_v12 }
 0xa6e   :  { %v3533_v54 = vpop.eup %3532 }
 0xa6f   :  { %1470 = vrot.lane.b32.xlu0 %v3533_v54, %s3834_s0  ;;  %v3535_v13 = vpop.eup %3534 }
 0xa70   :  { %1462 = vrot.lane.b32.xlu1 %v3535_v13, %s3834_s0 }
 0xa72   :  { %v3537_v34 = vpop.eup %3536 }
 0xa73   :  { %1472 = vrot.lane.b32.xlu0 %v3537_v34, %s3834_s0  ;;  %v3539_v6 = vpop.eup %3538 }
 0xa74   :  { %1466 = vrot.lane.b32.xlu1 %v3539_v6, %s3834_s0 }
 0xa76   :  { %v3541_v22 = vpop.eup %3540 }
 0xa77   :  { %1476 = vrot.lane.b32.xlu0 %v3541_v22, %s3834_s0  ;;  %v3543_v5 = vpop.eup %3542 }
 0xa78   :  { %1474 = vrot.lane.b32.xlu1 %v3543_v5, %s3834_s0 }
 0xadd   :  { %v1465_v56 = vpop.permute.xlu0 %1464 }
 0xade   :  { %v1469_v19 = vpop.permute.xlu1 %1468  ;;  %v1487_v21 = vmul.f32 %v4348_v37, %v1465_v56 }
 0xadf   :  { %v1489_v27 = vmul.f32 %v4351_v42, %v1469_v19 }
 0xae0   :  { %v1503_v60 = vrot.slane %v1487_v21, 2 }
 0xae1   :  { %v1471_v15 = vpop.permute.xlu0 %1470 }
 0xae2   :  { %v1463_v17 = vpop.permute.xlu1 %1462  ;;  %v1490_v7 = vmul.f32 %v4355_v3, %v1471_v15 }
 0xae3   :  { %v1486_v47 = vmul.f32 %v4359_v62, %v1463_v17 }
 0xae4   :  { %v1508_v16 = vrot.slane %v1490_v7, 7 }
 0xae5   :  { %v1473_v53 = vpop.permute.xlu0 %1472  ;;  %v1502_v18 = vrot.slane %v1486_v47, 3 }
 0xae6   :  { %v1467_v61 = vpop.permute.xlu1 %1466  ;;  %v1491_v58 = vmul.f32 %v4363_v26, %v1473_v53 }
 0xae7   :  { %v1488_v30 = vmul.f32 %v4367_v39, %v1467_v61  ;;  %v1504_v62 = vsel %vm488_vm2, %v1503_v60, %v1502_v18 }
 0xae8   :  { %v1510_v43 = vrot.slane %v1491_v58, 6 }
 0xae9   :  { %v1477_v20 = vpop.permute.xlu0 %1476  ;;  %v1505_v51 = vrot.slane %v1488_v30, 1 }
 0xaea   :  { %v1493_v31 = vmul.f32 %v4371_v55, %v1477_v20  ;;  %v1475_v37 = vpop.permute.xlu1 %1474 }
 0xaeb   :  { %v1506_v4 = vsel %vm491_vm3, %v1505_v51, %v1504_v62  ;;  %v1492_v26 = vmul.f32 %v4375_v50, %v1475_v37 }
 0xaec   :  { %v1507_v3 = vsel %vm494_vm4, %v1489_v27, %v1506_v4  ;;  %v1514_v10 = vrot.slane %v1493_v31, 4 }
 0xaed   :  { %v1509_v39 = vsel %vm497_vm5, %v1508_v16, %v1507_v3  ;;  %v1512_v48 = vrot.slane %v1492_v26, 5 }
 0xaee   :  { %v1511_v23 = vsel %vm500_vm6, %v1510_v43, %v1509_v39 }
 0xaef   :  { %v1513_v55 = vsel %vm503_vm7, %v1512_v48, %v1511_v23 }
 0xaf0   :  { %v1515_v42 = vsel %vm506_vm8, %v1514_v10, %v1513_v55 }
 0xaf1   :  { %1516 = vrot.lane.b32.xlu1 %v1515_v42, %s3835_s3 }
 0xb63   :  { %v1517_v57 = vpop.permute.xlu1 %1516 }
 0xb64   :  { %3172 = vmatmul.mubr.msk.f32.vlgmr.msra.gmra.mrb[10].mxu0 %vm60_vm1, %v1517_v57 }
 0xb65   :  { %3264 = vmatpush3.bf16.msra.mxu0 %v3904_v9  ;;  %3193 = vmatprep.mubr.msk.f32.mxu0 %vm3832_vm0, %v3833_v1 }
 0xb66   :  { %3265 = vmatprep.subr.bf16.mxu0 %v3831_v0 }
 0xb69   :  { %3267 = vmatpush3.bf16.msra.mxu0 %v3917_v14 }
 0xb6a   :  { %3274 = vmatprep.subr.bf16.mxu0 %v3831_v0 }
 0xc37   :  { %v1586_v50 = vpop.f32.mrb[10].mxu0 }
 0xc38   :  { %v1591_v46 = vrot.slane %v1586_v50, 4  ;;  %v3173_v35 = vpop.f32.mrb[11].mxu0  ;;  %v1593_v63 = vrot.slane %v1586_v50, 6  ;;  %v1595_v8 = vrot.slane %v1586_v50, 1  ;;  %v1592_v54 = vrot.slane %v1586_v50, 5 }
 0xc39   :  { %v1610_v13 = vadd.f32 %v1586_v50, %v3981_v44  ;;  %v1596_v6 = vrot.slane %v1586_v50, 2  ;;  %v1594_v5 = vrot.slane %v1586_v50, 7  ;;  %v1597_v15 = vrot.slane %v1586_v50, 3 }
 0xc3a   :  { %v1606_v38 = vadd.f32 %v1591_v46, %v3969_v28  ;;  %v1608_v11 = vadd.f32 %v1593_v63, %v3975_v36  ;;  %v1611_v22 = vadd.f32 %v1595_v8, %v3978_v41  ;;  %v1607_v56 = vadd.f32 %v1592_v54, %v3967_v25 }
 0xc3b   :  { %v1612_v19 = vadd.f32 %v1596_v6, %v3987_v52  ;;  %v1609_v17 = vadd.f32 %v1594_v5, %v3972_v33  ;;  %v1613_v21 = vadd.f32 %v1597_v15, %v3984_v49  ;;  %v3009_v51 = vmul.f32 -1.442695, %v1610_v13 }
 0xc3c   :  { %3544 = vtanh.f32 %v1606_v38  ;;  %v3005_v60 = vmul.f32 -1.442695, %v1606_v38  ;;  %v3007_v20 = vmul.f32 -1.442695, %v1608_v11  ;;  %v3010_v27 = vmul.f32 -1.442695, %v1611_v22 }
 0xc3d   :  { %3546 = vtanh.f32 %v1608_v11  ;;  %v3006_v62 = vmul.f32 -1.442695, %v1607_v56  ;;  %v3011_v37 = vmul.f32 -1.442695, %v1612_v19  ;;  %v3008_v16 = vmul.f32 -1.442695, %v1609_v17 }
 0xc3e   :  { %3548 = vtanh.f32 %v1610_v13  ;;  %v3012_v26 = vmul.f32 -1.442695, %v1613_v21 }
 0xc3f   :  { %3550 = vtanh.f32 %v1611_v22 }
 0xc40   :  { %3552 = vtanh.f32 %v1607_v56 }
 0xc41   :  { %3554 = vtanh.f32 %v1612_v19 }
 0xc42   :  { %3556 = vtanh.f32 %v1609_v17 }
 0xc43   :  { %3558 = vtanh.f32 %v1613_v21 }
 0xc44   :  { %3560 = vpow2.f32 %v3005_v60 }
 0xc45   :  { %3562 = vpow2.f32 %v3007_v20 }
 0xc46   :  { %v3545_v34 = vpop.eup %3544  ;;  %3564 = vpow2.f32 %v3009_v51 }
 0xc47   :  { %1710 = vrot.lane.b32.xlu0 %v3545_v34, %s3834_s0  ;;  %v3547_v47 = vpop.eup %3546  ;;  %3566 = vpow2.f32 %v3010_v27  ;;  %v1678_v27 = vrot.slane %v4398_v40, 7 }
 0xc48   :  { %v3549_v53 = vpop.eup %3548  ;;  %3568 = vpow2.f32 %v3006_v62 }
 0xc49   :  { %1718 = vrot.lane.b32.xlu1 %v3549_v53, %s3834_s0  ;;  %v3551_v18 = vpop.eup %3550 }
 0xc4a   :  { %v3553_v61 = vpop.eup %3552 }
 0xc4b   :  { %1714 = vrot.lane.b32.xlu0 %v3547_v47, %s3834_s0  ;;  %v3555_v58 = vpop.eup %3554 }
 0xc4c   :  { %v3557_v7 = vpop.eup %3556 }
 0xc4d   :  { %1712 = vrot.lane.b32.xlu1 %v3553_v61, %s3834_s0  ;;  %v3559_v30 = vpop.eup %3558 }
 0xc4e   :  { %v3561_v31 = vpop.eup %3560 }
 0xc4f   :  { %1720 = vrot.lane.b32.xlu0 %v3551_v18, %s3834_s0  ;;  %v1638_v43 = vadd.f32 1.0, %v3561_v31  ;;  %v3563_v4 = vpop.eup %3562 }
 0xc50   :  { %v3565_v3 = vpop.eup %3564  ;;  %v1640_v10 = vadd.f32 1.0, %v3563_v4  ;;  %v1682_v4 = vrot.slane %v4395_v32, 7 }
 0xc51   :  { %1716 = vrot.lane.b32.xlu1 %v3557_v7, %s3834_s0  ;;  %3570 = vrcp.f32 %v1638_v43  ;;  %v3567_v39 = vpop.eup %3566  ;;  %v1642_v48 = vadd.f32 1.0, %v3565_v3 }
 0xc52   :  { %3572 = vpow2.f32 %v3011_v37  ;;  %v3569_v23 = vpop.eup %3568  ;;  %v1643_v57 = vadd.f32 1.0, %v3567_v39 }
 0xc53   :  { %1722 = vrot.lane.b32.xlu0 %v3555_v58, %s3834_s0  ;;  %3574 = vpow2.f32 %v3008_v16  ;;  %v1639_v35 = vadd.f32 1.0, %v3569_v23  ;;  %v1680_v16 = vrot.slane %v4408_v59, 7 }
 0xc54   :  { %3576 = vpow2.f32 %v3012_v26 }
 0xc55   :  { %1724 = vrot.lane.b32.xlu1 %v3559_v30, %s3834_s0  ;;  %3578 = vrcp.f32 %v1640_v10  ;;  %v1683_v10 = vrot.slane %v4405_v24, 7 }
 0xc56   :  { %3580 = vrcp.f32 %v1642_v48 }
 0xc57   :  { %3582 = vrcp.f32 %v1643_v57 }
 0xc58   :  { %3584 = vrcp.f32 %v1639_v35 }
 0xc5b   :  { %v4467_v55 = vpop.eup %3570 }
 0xc5c   :  { %v3573_v50 = vpop.eup %3572  ;;  %v1694_v62 = vmul.f32 %v4467_v55, %v1678_v27 }
 0xc5d   :  { %v3575_v38 = vpop.eup %3574  ;;  %v1644_v63 = vadd.f32 1.0, %v3573_v50  ;;  %v1684_v50 = vrot.slane %v4417_v12, 7 }
 0xc5e   :  { %v1641_v8 = vadd.f32 1.0, %v3575_v38  ;;  %v3577_v11 = vpop.eup %3576 }
 0xc5f   :  { %3586 = vrcp.f32 %v1644_v63  ;;  %v4471_v54 = vpop.eup %3578  ;;  %v1645_v34 = vadd.f32 1.0, %v3577_v11 }
 0xc60   :  { %3588 = vrcp.f32 %v1641_v8  ;;  %v4474_v22 = vpop.eup %3580  ;;  %v1696_v26 = vmul.f32 %v4471_v54, %v1680_v16 }
 0xc61   :  { %v4478_v19 = vpop.eup %3582  ;;  %3590 = vrcp.f32 %v1645_v34  ;;  %v1698_v39 = vmul.f32 %v4474_v22, %v1682_v4  ;;  %v1685_v34 = vrot.slane %v4414_v2, 7 }
 0xc62   :  { %v4482_v47 = vpop.eup %3584  ;;  %v1699_v59 = vmul.f32 %v4478_v19, %v1683_v10 }
 0xc69   :  { %v4486_v18 = vpop.eup %3586 }
 0xc6a   :  { %v4490_v7 = vpop.eup %3588  ;;  %v1700_v63 = vmul.f32 %v4486_v18, %v1684_v50 }
 0xc6b   :  { %v4495_v20 = vpop.eup %3590 }
 0xcb9   :  { %v1711_v42 = vpop.permute.xlu0 %1710 }
 0xcba   :  { %v1734_v46 = vmul.f32 %v4467_v55, %v1711_v42  ;;  %v1679_v42 = vrot.slane %v4385_v29, 7  ;;  %v1681_v29 = vrot.slane %v4388_v45, 7 }
 0xcbb   :  { %v1719_v5 = vpop.permute.xlu1 %1718 }
 0xcbc   :  { %1750 = vrot.lane.b32.xlu0 %v1734_v46, %s3835_s3  ;;  %v1738_v56 = vmul.f32 %v4474_v22, %v1719_v5  ;;  %v1695_v24 = vmul.f32 %v4482_v47, %v1679_v42  ;;  %v1697_v12 = vmul.f32 %v4490_v7, %v1681_v29  ;;  %v1701_v5 = vmul.f32 %v4495_v20, %v1685_v34 }
 0xcbd   :  { %v1715_v13 = vpop.permute.xlu0 %1714 }
 0xcbe   :  { %v1736_v6 = vmul.f32 %v4471_v54, %v1715_v13  ;;  %1758 = vrot.lane.b32.xlu1 %v1738_v56, %s3835_s3 }
 0xcbf   :  { %v1713_v21 = vpop.permute.xlu1 %1712 }
 0xcc0   :  { %1754 = vrot.lane.b32.xlu0 %v1736_v6, %s3835_s3  ;;  %v1735_v53 = vmul.f32 %v4482_v47, %v1713_v21 }
 0xcc1   :  { %v1721_v15 = vpop.permute.xlu0 %1720 }
 0xcc2   :  { %v1739_v17 = vmul.f32 %v4478_v19, %v1721_v15  ;;  %1752 = vrot.lane.b32.xlu1 %v1735_v53, %s3835_s3 }
 0xcc3   :  { %v1717_v30 = vpop.permute.xlu1 %1716 }
 0xcc4   :  { %1760 = vrot.lane.b32.xlu0 %v1739_v17, %s3835_s3  ;;  %v1737_v60 = vmul.f32 %v4490_v7, %v1717_v30 }
 0xcc5   :  { %v1723_v61 = vpop.permute.xlu0 %1722 }
 0xcc6   :  { %v1740_v58 = vmul.f32 %v4486_v18, %v1723_v61  ;;  %1756 = vrot.lane.b32.xlu1 %v1737_v60, %s3835_s3 }
 0xcc7   :  { %v1725_v51 = vpop.permute.xlu1 %1724 }
 0xcc8   :  { %1762 = vrot.lane.b32.xlu0 %v1740_v58, %s3835_s3  ;;  %v1741_v31 = vmul.f32 %v4495_v20, %v1725_v51 }
 0xcca   :  { %1764 = vrot.lane.b32.xlu1 %v1741_v31, %s3835_s3 }
 0xd2e   :  { %v1751_v43 = vpop.permute.xlu0 %1750 }
 0xd2f   :  { %v4501_v37 = vadd.f32 %v1751_v43, %v1694_v62 }
 0xd30   :  { %v1759_v40 = vpop.permute.xlu1 %1758 }
 0xd31   :  { %3592 = vtanh.f32 %v4501_v37  ;;  %v4512_v57 = vadd.f32 %v1759_v40, %v1698_v39 }
 0xd32   :  { %v1755_v3 = vpop.permute.xlu0 %1754 }
 0xd33   :  { %v4509_v48 = vadd.f32 %v1755_v3, %v1696_v26 }
 0xd34   :  { %v1753_v35 = vpop.permute.xlu1 %1752 }
 0xd35   :  { %3594 = vtanh.f32 %v4509_v48  ;;  %v4523_v38 = vadd.f32 %v1753_v35, %v1695_v24 }
 0xd36   :  { %v1761_v32 = vpop.permute.xlu0 %1760  ;;  %3596 = vtanh.f32 %v4512_v57 }
 0xd37   :  { %v4520_v46 = vadd.f32 %v1761_v32, %v1699_v59 }
 0xd38   :  { %v1757_v13 = vpop.permute.xlu1 %1756 }
 0xd39   :  { %3598 = vtanh.f32 %v4520_v46  ;;  %v4532_v6 = vadd.f32 %v1757_v13, %v1697_v12 }
 0xd3a   :  { %v1763_v8 = vpop.permute.xlu0 %1762  ;;  %3600 = vtanh.f32 %v4523_v38 }
 0xd3b   :  { %v3593_v23 = vpop.eup %3592  ;;  %v4529_v11 = vadd.f32 %v1763_v8, %v1700_v63 }
 0xd3c   :  { %1798 = vrot.lane.b32.xlu0 %v3593_v23, %s3834_s0  ;;  %v1765_v56 = vpop.permute.xlu1 %1764 }
 0xd3d   :  { %3602 = vtanh.f32 %v4529_v11  ;;  %v4538_v17 = vadd.f32 %v1765_v56, %v1701_v5 }
 0xd3e   :  { %3604 = vtanh.f32 %v4532_v6 }
 0xd3f   :  { %v3595_v45 = vpop.eup %3594  ;;  %3606 = vtanh.f32 %v4538_v17 }
 0xd40   :  { %1802 = vrot.lane.b32.xlu0 %v3595_v45, %s3834_s0  ;;  %v3597_v15 = vpop.eup %3596 }
 0xd41   :  { %1806 = vrot.lane.b32.xlu1 %v3597_v15, %s3834_s0 }
 0xd43   :  { %v3599_v21 = vpop.eup %3598 }
 0xd44   :  { %1808 = vrot.lane.b32.xlu0 %v3599_v21, %s3834_s0  ;;  %v3601_v2 = vpop.eup %3600 }
 0xd45   :  { %1800 = vrot.lane.b32.xlu1 %v3601_v2, %s3834_s0 }
 0xd47   :  { %v3603_v53 = vpop.eup %3602 }
 0xd48   :  { %1810 = vrot.lane.b32.xlu0 %v3603_v53, %s3834_s0  ;;  %v3605_v61 = vpop.eup %3604 }
 0xd49   :  { %1804 = vrot.lane.b32.xlu1 %v3605_v61, %s3834_s0  ;;  %v3607_v58 = vpop.eup %3606 }
 0xd4d   :  { %1812 = vrot.lane.b32.xlu1 %v3607_v58, %s3834_s0 }
 0xdae   :  { %v1799_v30 = vpop.permute.xlu0 %1798 }
 0xdaf   :  { %v1822_v62 = vmul.f32 %v4467_v55, %v1799_v30 }
 0xdb1   :  { %v1838_v3 = vrot.slane %v1822_v62, 4 }
 0xdb2   :  { %v1803_v60 = vpop.permute.xlu0 %1802 }
 0xdb3   :  { %v1807_v51 = vpop.permute.xlu1 %1806  ;;  %v1824_v31 = vmul.f32 %v4471_v54, %v1803_v60 }
 0xdb4   :  { %v1826_v50 = vmul.f32 %v4474_v22, %v1807_v51 }
 0xdb5   :  { %v1841_v4 = vrot.slane %v1824_v31, 2 }
 0xdb6   :  { %v1809_v27 = vpop.permute.xlu0 %1808 }
 0xdb7   :  { %v1801_v43 = vpop.permute.xlu1 %1800  ;;  %v1827_v39 = vmul.f32 %v4478_v19, %v1809_v27 }
 0xdb8   :  { %v1823_v16 = vmul.f32 %v4482_v47, %v1801_v43 }
 0xdb9   :  { %v1846_v55 = vrot.slane %v1827_v39, 7 }
 0xdba   :  { %v1811_v26 = vpop.permute.xlu0 %1810  ;;  %v1839_v10 = vrot.slane %v1823_v16, 3 }
 0xdbb   :  { %v1805_v40 = vpop.permute.xlu1 %1804  ;;  %v1828_v23 = vmul.f32 %v4486_v18, %v1811_v26 }
 0xdbc   :  { %v1840_v42 = vsel %vm488_vm2, %v1839_v10, %v1838_v3  ;;  %v1825_v59 = vmul.f32 %v4490_v7, %v1805_v40 }
 0xdbd   :  { %v1842_v54 = vsel %vm491_vm3, %v1841_v4, %v1840_v42  ;;  %v1848_v24 = vrot.slane %v1828_v23, 6 }
 0xdbe   :  { %v1843_v32 = vrot.slane %v1825_v59, 1 }
 0xdbf   :  { %v1813_v47 = vpop.permute.xlu1 %1812 }
 0xdc0   :  { %v1844_v35 = vsel %vm494_vm4, %v1843_v32, %v1842_v54  ;;  %v1829_v29 = vmul.f32 %v4495_v20, %v1813_v47 }
 0xdc1   :  { %v1845_v19 = vsel %vm497_vm5, %v1826_v50, %v1844_v35 }
 0xdc2   :  { %v1847_v18 = vsel %vm500_vm6, %v1846_v55, %v1845_v19  ;;  %v1850_v63 = vrot.slane %v1829_v29, 5 }
 0xdc3   :  { %v1849_v8 = vsel %vm503_vm7, %v1848_v24, %v1847_v18 }
 0xdc4   :  { %v1851_v7 = vsel %vm506_vm8, %v1850_v63, %v1849_v8 }
 0xdc5   :  { %1852 = vrot.lane.b32.xlu0 %v1851_v7, %s3835_s3 }
 0xe37   :  { %v1853_v12 = vpop.permute.xlu0 %1852 }
 0xe38   :  { %3183 = vmatmul.mubr.msk.f32.vlgmr.msra.gmra.mrb[6].mxu1 %vm60_vm1, %v1853_v12 }
 0xe39   :  { %3270 = vmatpush3.bf16.msra.mxu1 %v3904_v9  ;;  %3204 = vmatprep.mubr.msk.f32.mxu1 %vm3832_vm0, %v3833_v1 }
 0xe3a   :  { %3271 = vmatprep.subr.bf16.mxu1 %v3831_v0 }
 0xe3d   :  { %3273 = vmatpush3.bf16.msra.mxu1 %v3917_v14 }
 0xf0b   :  { %v1922_v22 = vpop.f32.mrb[6].mxu1 }
 0xf0c   :  { %v1927_v20 = vrot.slane %v1922_v22, 3  ;;  %v3184_v13 = vpop.f32.mrb[7].mxu1  ;;  %v1928_v45 = vrot.slane %v1922_v22, 4  ;;  %v1929_v5 = vrot.slane %v1922_v22, 5  ;;  %v1930_v56 = vrot.slane %v1922_v22, 6 }
 0xf0d   :  { %v1931_v21 = vrot.slane %v1922_v22, 7  ;;  %v1932_v2 = vrot.slane %v1922_v22, 1  ;;  %v1933_v58 = vrot.slane %v1922_v22, 2  ;;  %v1947_v60 = vadd.f32 %v1922_v22, %v3978_v41 }
 0xf0e   :  { %v1942_v34 = vadd.f32 %v1927_v20, %v3969_v28  ;;  %v1943_v15 = vadd.f32 %v1928_v45, %v3967_v25  ;;  %v1944_v9 = vadd.f32 %v1929_v5, %v3975_v36  ;;  %v1945_v53 = vadd.f32 %v1930_v56, %v3972_v33 }
 0xf0f   :  { %v1946_v14 = vadd.f32 %v1931_v21, %v3981_v44  ;;  %v1948_v30 = vadd.f32 %v1932_v2, %v3987_v52  ;;  %v1949_v51 = vadd.f32 %v1933_v58, %v3984_v49  ;;  %v3019_v32 = vmul.f32 -1.442695, %v1947_v60 }
 0xf10   :  { %3608 = vtanh.f32 %v1942_v34  ;;  %v3014_v3 = vmul.f32 -1.442695, %v1942_v34  ;;  %v3015_v10 = vmul.f32 -1.442695, %v1943_v15  ;;  %v3016_v39 = vmul.f32 -1.442695, %v1944_v9 }
 0xf11   :  { %3610 = vtanh.f32 %v1943_v15  ;;  %v3017_v40 = vmul.f32 -1.442695, %v1945_v53  ;;  %v3018_v42 = vmul.f32 -1.442695, %v1946_v14  ;;  %v3020_v59 = vmul.f32 -1.442695, %v1948_v30 }
 0xf12   :  { %3612 = vtanh.f32 %v1944_v9  ;;  %v3021_v55 = vmul.f32 -1.442695, %v1949_v51 }
 0xf13   :  { %3614 = vtanh.f32 %v1945_v53 }
 0xf14   :  { %3616 = vtanh.f32 %v1946_v14 }
 0xf15   :  { %3618 = vtanh.f32 %v1948_v30 }
 0xf16   :  { %3620 = vtanh.f32 %v1947_v60 }
 0xf17   :  { %3622 = vtanh.f32 %v1949_v51 }
 0xf18   :  { %3624 = vpow2.f32 %v3014_v3 }
 0xf19   :  { %3626 = vpow2.f32 %v3015_v10 }
 0xf1a   :  { %v3609_v61 = vpop.eup %3608  ;;  %3628 = vpow2.f32 %v3016_v39  ;;  %v2014_v39 = vrot.slane %v4501_v37, 7 }
 0xf1b   :  { %2046 = vrot.lane.b32.xlu1 %v3609_v61, %s3834_s0  ;;  %v3611_v31 = vpop.eup %3610  ;;  %3630 = vpow2.f32 %v3017_v40 }
 0xf1c   :  { %v3613_v27 = vpop.eup %3612  ;;  %2048 = vrot.lane.b32.xlu0 %v3611_v31, %s3834_s0  ;;  %3632 = vpow2.f32 %v3018_v42 }
 0xf1d   :  { %v3615_v62 = vpop.eup %3614  ;;  %3634 = vpow2.f32 %v3020_v59  ;;  %v2015_v59 = vrot.slane %v4523_v38, 7 }
 0xf1e   :  { %v3617_v43 = vpop.eup %3616 }
 0xf1f   :  { %2050 = vrot.lane.b32.xlu1 %v3613_v27, %s3834_s0  ;;  %v3619_v16 = vpop.eup %3618 }
 0xf20   :  { %2052 = vrot.lane.b32.xlu0 %v3615_v62, %s3834_s0  ;;  %v3621_v4 = vpop.eup %3620 }
 0xf21   :  { %v3623_v26 = vpop.eup %3622 }
 0xf22   :  { %v3625_v23 = vpop.eup %3624 }
 0xf23   :  { %2054 = vrot.lane.b32.xlu1 %v3617_v43, %s3834_s0  ;;  %v1974_v54 = vadd.f32 1.0, %v3625_v23  ;;  %v3627_v50 = vpop.eup %3626 }
 0xf24   :  { %2058 = vrot.lane.b32.xlu0 %v3619_v16, %s3834_s0  ;;  %v3629_v47 = vpop.eup %3628  ;;  %v1975_v24 = vadd.f32 1.0, %v3627_v50 }
 0xf25   :  { %3636 = vrcp.f32 %v1974_v54  ;;  %v3631_v35 = vpop.eup %3630  ;;  %v1976_v29 = vadd.f32 1.0, %v3629_v47  ;;  %v2016_v54 = vrot.slane %v4509_v48, 7  ;;  %v2017_v47 = vrot.slane %v4532_v6, 7 }
 0xf26   :  { %3638 = vpow2.f32 %v3019_v32  ;;  %v3633_v19 = vpop.eup %3632  ;;  %v1977_v63 = vadd.f32 1.0, %v3631_v35  ;;  %v2018_v35 = vrot.slane %v4512_v57, 7  ;;  %v2019_v57 = vrot.slane %v4520_v46, 7 }
 0xf27   :  { %2056 = vrot.lane.b32.xlu1 %v3621_v4, %s3834_s0  ;;  %3640 = vpow2.f32 %v3021_v55  ;;  %v3635_v18 = vpop.eup %3634  ;;  %v1978_v12 = vadd.f32 1.0, %v3633_v19 }
 0xf28   :  { %2060 = vrot.lane.b32.xlu0 %v3623_v26, %s3834_s0  ;;  %3642 = vrcp.f32 %v1975_v24  ;;  %v1980_v13 = vadd.f32 1.0, %v3635_v18 }
 0xf29   :  { %3644 = vrcp.f32 %v1976_v29 }
 0xf2a   :  { %3646 = vrcp.f32 %v1977_v63  ;;  %v2020_v63 = vrot.slane %v4529_v11, 7  ;;  %v2021_v11 = vrot.slane %v4538_v17, 7 }
 0xf2b   :  { %3648 = vrcp.f32 %v1978_v12 }
 0xf2c   :  { %3650 = vrcp.f32 %v1980_v13 }
 0xf2f   :  { %v4585_v8 = vpop.eup %3636 }
 0xf30   :  { %v3639_v22 = vpop.eup %3638  ;;  %v2030_v40 = vmul.f32 %v4585_v8, %v2014_v39 }
 0xf31   :  { %v3641_v34 = vpop.eup %3640  ;;  %v1979_v45 = vadd.f32 1.0, %v3639_v22 }
 0xf32   :  { %v1981_v5 = vadd.f32 1.0, %v3641_v34  ;;  %v4589_v56 = vpop.eup %3642 }
 0xf33   :  { %3652 = vrcp.f32 %v1979_v45  ;;  %v4591_v21 = vpop.eup %3644  ;;  %v2031_v32 = vmul.f32 %v4589_v56, %v2015_v59 }
 0xf34   :  { %3654 = vrcp.f32 %v1981_v5  ;;  %v4596_v61 = vpop.eup %3646  ;;  %v2032_v50 = vmul.f32 %v4591_v21, %v2016_v54 }
 0xf35   :  { %v4599_v58 = vpop.eup %3648  ;;  %v2033_v38 = vmul.f32 %v4596_v61, %v2017_v47 }
 0xf36   :  { %v4604_v31 = vpop.eup %3650  ;;  %v2034_v18 = vmul.f32 %v4599_v58, %v2018_v35 }
 0xf37   :  { %v2036_v22 = vmul.f32 %v4604_v31, %v2020_v63 }
 0xf3d   :  { %v4607_v62 = vpop.eup %3652 }
 0xf3e   :  { %v4612_v26 = vpop.eup %3654  ;;  %v2035_v13 = vmul.f32 %v4607_v62, %v2019_v57 }
 0xf3f   :  { %v2037_v46 = vmul.f32 %v4612_v26, %v2021_v11 }
 0xf8d   :  { %v2047_v7 = vpop.permute.xlu1 %2046 }
 0xf8e   :  { %v2070_v20 = vmul.f32 %v4585_v8, %v2047_v7  ;;  %v2049_v15 = vpop.permute.xlu0 %2048 }
 0xf8f   :  { %v2071_v9 = vmul.f32 %v4589_v56, %v2049_v15 }
 0xf90   :  { %2086 = vrot.lane.b32.xlu1 %v2070_v20, %s3835_s3 }
 0xf91   :  { %v2051_v2 = vpop.permute.xlu1 %2050  ;;  %2088 = vrot.lane.b32.xlu0 %v2071_v9, %s3835_s3 }
 0xf92   :  { %v2072_v53 = vmul.f32 %v4591_v21, %v2051_v2  ;;  %v2053_v14 = vpop.permute.xlu0 %2052 }
 0xf93   :  { %v2073_v30 = vmul.f32 %v4596_v61, %v2053_v14 }
 0xf94   :  { %2090 = vrot.lane.b32.xlu1 %v2072_v53, %s3835_s3 }
 0xf95   :  { %v2055_v60 = vpop.permute.xlu1 %2054  ;;  %2092 = vrot.lane.b32.xlu0 %v2073_v30, %s3835_s3 }
 0xf96   :  { %v2074_v51 = vmul.f32 %v4599_v58, %v2055_v60  ;;  %v2059_v27 = vpop.permute.xlu0 %2058 }
 0xf97   :  { %v2076_v43 = vmul.f32 %v4604_v31, %v2059_v27 }
 0xf98   :  { %2094 = vrot.lane.b32.xlu1 %v2074_v51, %s3835_s3 }
 0xf99   :  { %v2057_v16 = vpop.permute.xlu1 %2056  ;;  %2098 = vrot.lane.b32.xlu0 %v2076_v43, %s3835_s3 }
 0xf9a   :  { %v2075_v4 = vmul.f32 %v4607_v62, %v2057_v16  ;;  %v2061_v3 = vpop.permute.xlu0 %2060 }
 0xf9b   :  { %v2077_v10 = vmul.f32 %v4612_v26, %v2061_v3 }
 0xf9c   :  { %2096 = vrot.lane.b32.xlu1 %v2075_v4, %s3835_s3 }
 0xf9d   :  { %2100 = vrot.lane.b32.xlu0 %v2077_v10, %s3835_s3 }
0x1002   :  { %v2087_v23 = vpop.permute.xlu1 %2086 }
0x1003   :  { %v4619_v42 = vadd.f32 %v2087_v23, %v2030_v40  ;;  %v2089_v55 = vpop.permute.xlu0 %2088 }
0x1004   :  { %v4627_v24 = vadd.f32 %v2089_v55, %v2031_v32 }
0x1005   :  { %3656 = vtanh.f32 %v4619_v42 }
0x1006   :  { %v2091_v37 = vpop.permute.xlu1 %2090  ;;  %3658 = vtanh.f32 %v4627_v24 }
0x1007   :  { %v4630_v29 = vadd.f32 %v2091_v37, %v2032_v50  ;;  %v2093_v48 = vpop.permute.xlu0 %2092 }
0x1008   :  { %v4637_v6 = vadd.f32 %v2093_v48, %v2033_v38 }
0x1009   :  { %3660 = vtanh.f32 %v4630_v29 }
0x100a   :  { %v2095_v7 = vpop.permute.xlu1 %2094  ;;  %3662 = vtanh.f32 %v4637_v6 }
0x100b   :  { %v4641_v12 = vadd.f32 %v2095_v7, %v2034_v18  ;;  %v2099_v20 = vpop.permute.xlu0 %2098 }
0x100c   :  { %v4648_v34 = vadd.f32 %v2099_v20, %v2036_v22 }
0x100d   :  { %3664 = vtanh.f32 %v4641_v12 }
0x100e   :  { %v2097_v45 = vpop.permute.xlu1 %2096  ;;  %3666 = vtanh.f32 %v4648_v34 }
0x100f   :  { %v3657_v19 = vpop.eup %3656  ;;  %v4650_v5 = vadd.f32 %v2097_v45, %v2035_v13  ;;  %v2101_v15 = vpop.permute.xlu0 %2100 }
0x1010   :  { %2134 = vrot.lane.b32.xlu1 %v3657_v19, %s3834_s0  ;;  %v3659_v9 = vpop.eup %3658  ;;  %v4655_v2 = vadd.f32 %v2101_v15, %v2037_v46 }
0x1011   :  { %3668 = vtanh.f32 %v4650_v5  ;;  %2136 = vrot.lane.b32.xlu0 %v3659_v9, %s3834_s0 }
0x1012   :  { %3670 = vtanh.f32 %v4655_v2 }
0x1013   :  { %v3661_v53 = vpop.eup %3660 }
0x1014   :  { %2138 = vrot.lane.b32.xlu1 %v3661_v53, %s3834_s0  ;;  %v3663_v17 = vpop.eup %3662 }
0x1015   :  { %2140 = vrot.lane.b32.xlu0 %v3663_v17, %s3834_s0 }
0x1017   :  { %v3665_v14 = vpop.eup %3664 }
0x1018   :  { %2142 = vrot.lane.b32.xlu1 %v3665_v14, %s3834_s0  ;;  %v3667_v30 = vpop.eup %3666 }
0x1019   :  { %2146 = vrot.lane.b32.xlu0 %v3667_v30, %s3834_s0 }
0x101b   :  { %v3669_v60 = vpop.eup %3668 }
0x101c   :  { %2144 = vrot.lane.b32.xlu1 %v3669_v60, %s3834_s0  ;;  %v3671_v51 = vpop.eup %3670 }
0x101d   :  { %2148 = vrot.lane.b32.xlu0 %v3671_v51, %s3834_s0 }
0x1082   :  { %v2135_v27 = vpop.permute.xlu1 %2134 }
0x1083   :  { %v2158_v43 = vmul.f32 %v4585_v8, %v2135_v27  ;;  %v2137_v16 = vpop.permute.xlu0 %2136 }
0x1084   :  { %v2159_v4 = vmul.f32 %v4589_v56, %v2137_v16 }
0x1085   :  { %v2174_v3 = vrot.slane %v2158_v43, 5 }
0x1086   :  { %v2139_v10 = vpop.permute.xlu1 %2138  ;;  %v2175_v40 = vrot.slane %v2159_v4, 4 }
0x1087   :  { %v2160_v39 = vmul.f32 %v4591_v21, %v2139_v10  ;;  %v2141_v23 = vpop.permute.xlu0 %2140 }
0x1088   :  { %v2176_v54 = vsel %vm488_vm2, %v2175_v40, %v2174_v3  ;;  %v2161_v32 = vmul.f32 %v4596_v61, %v2141_v23 }
0x1089   :  { %v2177_v59 = vrot.slane %v2160_v39, 3 }
0x108a   :  { %v2143_v55 = vpop.permute.xlu1 %2142  ;;  %v2179_v8 = vrot.slane %v2161_v32, 2 }
0x108b   :  { %v2178_v50 = vsel %vm491_vm3, %v2177_v59, %v2176_v54  ;;  %v2162_v47 = vmul.f32 %v4599_v58, %v2143_v55  ;;  %v2147_v37 = vpop.permute.xlu0 %2146 }
0x108c   :  { %v2164_v56 = vmul.f32 %v4604_v31, %v2147_v37  ;;  %v2180_v38 = vsel %vm494_vm4, %v2179_v8, %v2178_v50 }
0x108d   :  { %v2181_v35 = vrot.slane %v2162_v47, 1 }
0x108e   :  { %v2145_v21 = vpop.permute.xlu1 %2144  ;;  %v2184_v18 = vrot.slane %v2164_v56, 7 }
0x108f   :  { %v2182_v19 = vsel %vm497_vm5, %v2181_v35, %v2180_v38  ;;  %v2163_v48 = vmul.f32 %v4607_v62, %v2145_v21  ;;  %v2149_v63 = vpop.permute.xlu0 %2148 }
0x1090   :  { %v2165_v7 = vmul.f32 %v4612_v26, %v2149_v63 }
0x1091   :  { %v2183_v61 = vsel %vm500_vm6, %v2163_v48, %v2182_v19 }
0x1092   :  { %v2185_v58 = vsel %vm503_vm7, %v2184_v18, %v2183_v61  ;;  %v2186_v57 = vrot.slane %v2165_v7, 6 }
0x1094   :  { %v2187_v22 = vsel %vm506_vm8, %v2186_v57, %v2185_v58 }
0x1095   :  { %2188 = vrot.lane.b32.xlu1 %v2187_v22, %s3835_s3 }
0x1107   :  { %v2189_v31 = vpop.permute.xlu1 %2188 }
0x1108   :  { %3194 = vmatmul.mubr.msk.f32.vlgmr.msra.gmra.mrb[12].mxu0 %vm60_vm1, %v2189_v31 }
0x1109   :  { %3215 = vmatprep.mubr.msk.f32.mxu0 %vm3832_vm0, %v3833_v1 }
0x11db   :  { %v2258_v62 = vpop.f32.mrb[12].mxu0 }
0x11dc   :  { %v2263_v20 = vrot.slane %v2258_v62, 2  ;;  %v3195_v13 = vpop.f32.mrb[13].mxu0  ;;  %v2264_v26 = vrot.slane %v2258_v62, 3  ;;  %v2265_v45 = vrot.slane %v2258_v62, 4  ;;  %v2266_v46 = vrot.slane %v2258_v62, 5 }
0x11dd   :  { %v2267_v9 = vrot.slane %v2258_v62, 6  ;;  %v2268_v17 = vrot.slane %v2258_v62, 7  ;;  %v2269_v1 = vrot.slane %v2258_v62, 1  ;;  %v2284_v43 = vadd.f32 %v2258_v62, %v3987_v52 }
0x11de   :  { %v2278_v11 = vadd.f32 %v2263_v20, %v3969_v28  ;;  %v2279_v15 = vadd.f32 %v2264_v26, %v3967_v25  ;;  %v2280_v53 = vadd.f32 %v2265_v45, %v3975_v36  ;;  %v2281_v14 = vadd.f32 %v2266_v46, %v3972_v33 }
0x11df   :  { %v2282_v60 = vadd.f32 %v2267_v9, %v3981_v44  ;;  %v2283_v51 = vadd.f32 %v2268_v17, %v3978_v41  ;;  %v2285_v27 = vadd.f32 %v2269_v1, %v3984_v49  ;;  %v3029_v56 = vmul.f32 -1.442695, %v2284_v43 }
0x11e0   :  { %3672 = vtanh.f32 %v2278_v11  ;;  %v3023_v59 = vmul.f32 -1.442695, %v2278_v11  ;;  %v3024_v54 = vmul.f32 -1.442695, %v2279_v15  ;;  %v3025_v32 = vmul.f32 -1.442695, %v2280_v53 }
0x11e1   :  { %3674 = vtanh.f32 %v2279_v15  ;;  %v3026_v55 = vmul.f32 -1.442695, %v2281_v14  ;;  %v3027_v47 = vmul.f32 -1.442695, %v2282_v60  ;;  %v3028_v8 = vmul.f32 -1.442695, %v2283_v51 }
0x11e2   :  { %3676 = vtanh.f32 %v2280_v53  ;;  %v3030_v35 = vmul.f32 -1.442695, %v2285_v27 }
0x11e3   :  { %3678 = vtanh.f32 %v2281_v14 }
0x11e4   :  { %3680 = vtanh.f32 %v2282_v60 }
0x11e5   :  { %3682 = vtanh.f32 %v2283_v51 }
0x11e6   :  { %3684 = vtanh.f32 %v2285_v27 }
0x11e7   :  { %3686 = vtanh.f32 %v2284_v43 }
0x11e8   :  { %3688 = vpow2.f32 %v3023_v59 }
0x11e9   :  { %3690 = vpow2.f32 %v3024_v54  ;;  %v2350_v54 = vrot.slane %v4619_v42, 7 }
0x11ea   :  { %v3673_v30 = vpop.eup %3672  ;;  %3692 = vpow2.f32 %v3025_v32 }
0x11eb   :  { %2382 = vrot.lane.b32.xlu0 %v3673_v30, %s3834_s0  ;;  %v3675_v16 = vpop.eup %3674  ;;  %3694 = vpow2.f32 %v3026_v55 }
0x11ec   :  { %v3677_v4 = vpop.eup %3676  ;;  %2384 = vrot.lane.b32.xlu1 %v3675_v16, %s3834_s0  ;;  %3696 = vpow2.f32 %v3027_v47  ;;  %v2351_v47 = vrot.slane %v4627_v24, 7 }
0x11ed   :  { %v3679_v3 = vpop.eup %3678  ;;  %3698 = vpow2.f32 %v3028_v8  ;;  %v2352_v8 = vrot.slane %v4630_v29, 7 }
0x11ee   :  { %v3681_v10 = vpop.eup %3680 }
0x11ef   :  { %2386 = vrot.lane.b32.xlu0 %v3677_v4, %s3834_s0  ;;  %v3683_v39 = vpop.eup %3682 }
0x11f0   :  { %2388 = vrot.lane.b32.xlu1 %v3679_v3, %s3834_s0  ;;  %v3685_v40 = vpop.eup %3684 }
0x11f1   :  { %v3687_v23 = vpop.eup %3686 }
0x11f2   :  { %v3689_v50 = vpop.eup %3688 }
0x11f3   :  { %2390 = vrot.lane.b32.xlu0 %v3681_v10, %s3834_s0  ;;  %v2310_v37 = vadd.f32 1.0, %v3689_v50  ;;  %v3691_v38 = vpop.eup %3690 }
0x11f4   :  { %2392 = vrot.lane.b32.xlu1 %v3683_v39, %s3834_s0  ;;  %v3693_v21 = vpop.eup %3692  ;;  %v2311_v19 = vadd.f32 1.0, %v3691_v38  ;;  %v2353_v38 = vrot.slane %v4637_v6, 7 }
0x11f5   :  { %3700 = vrcp.f32 %v2310_v37  ;;  %v3695_v48 = vpop.eup %3694  ;;  %v2312_v18 = vadd.f32 1.0, %v3693_v21 }
0x11f6   :  { %3702 = vpow2.f32 %v3030_v35  ;;  %v3697_v63 = vpop.eup %3696  ;;  %v2313_v7 = vadd.f32 1.0, %v3695_v48 }
0x11f7   :  { %2396 = vrot.lane.b32.xlu0 %v3685_v40, %s3834_s0  ;;  %3704 = vpow2.f32 %v3029_v56  ;;  %v3699_v61 = vpop.eup %3698  ;;  %v2314_v22 = vadd.f32 1.0, %v3697_v63 }
0x11f8   :  { %2394 = vrot.lane.b32.xlu1 %v3687_v23, %s3834_s0  ;;  %3706 = vrcp.f32 %v2311_v19  ;;  %v2315_v20 = vadd.f32 1.0, %v3699_v61  ;;  %v2354_v19 = vrot.slane %v4641_v12, 7  ;;  %v2355_v61 = vrot.slane %v4650_v5, 7 }
0x11f9   :  { %3708 = vrcp.f32 %v2312_v18  ;;  %v2357_v12 = vrot.slane %v4655_v2, 7  ;;  %v2356_v5 = vrot.slane %v4648_v34, 7 }
0x11fa   :  { %3710 = vrcp.f32 %v2313_v7 }
0x11fb   :  { %3712 = vrcp.f32 %v2314_v22 }
0x11fc   :  { %3714 = vrcp.f32 %v2315_v20 }
0x11ff   :  { %v4700_v58 = vpop.eup %3700 }
0x1200   :  { %v3703_v31 = vpop.eup %3702  ;;  %v2366_v32 = vmul.f32 %v4700_v58, %v2350_v54 }
0x1201   :  { %v3705_v13 = vpop.eup %3704  ;;  %v2317_v11 = vadd.f32 1.0, %v3703_v31 }
0x1202   :  { %v2316_v26 = vadd.f32 1.0, %v3705_v13  ;;  %v4704_v45 = vpop.eup %3706 }
0x1203   :  { %3716 = vrcp.f32 %v2317_v11  ;;  %v4706_v15 = vpop.eup %3708  ;;  %v2367_v37 = vmul.f32 %v4704_v45, %v2351_v47 }
0x1204   :  { %3718 = vrcp.f32 %v2316_v26  ;;  %v4711_v14 = vpop.eup %3710  ;;  %v2368_v56 = vmul.f32 %v4706_v15, %v2352_v8 }
0x1205   :  { %v4714_v1 = vpop.eup %3712  ;;  %v2369_v24 = vmul.f32 %v4711_v14, %v2353_v38 }
0x1206   :  { %v4719_v43 = vpop.eup %3714  ;;  %v2370_v63 = vmul.f32 %v4714_v1, %v2354_v19 }
0x1207   :  { %v2371_v22 = vmul.f32 %v4719_v43, %v2355_v61 }
0x120d   :  { %v4722_v4 = vpop.eup %3716 }
0x120e   :  { %v4727_v40 = vpop.eup %3718 }
0x120f   :  { %v2372_v2 = vmul.f32 %v4727_v40, %v2356_v5 }
0x125d   :  { %v2383_v57 = vpop.permute.xlu0 %2382 }
0x125e   :  { %v2406_v62 = vmul.f32 %v4700_v58, %v2383_v57  ;;  %v2385_v46 = vpop.permute.xlu1 %2384 }
0x125f   :  { %v2407_v9 = vmul.f32 %v4704_v45, %v2385_v46 }
0x1260   :  { %2422 = vrot.lane.b32.xlu0 %v2406_v62, %s3835_s3  ;;  %v2373_v62 = vmul.f32 %v4722_v4, %v2357_v12 }
0x1261   :  { %v2387_v53 = vpop.permute.xlu0 %2386  ;;  %2424 = vrot.lane.b32.xlu1 %v2407_v9, %s3835_s3 }
0x1262   :  { %v2408_v17 = vmul.f32 %v4706_v15, %v2387_v53  ;;  %v2389_v30 = vpop.permute.xlu1 %2388 }
0x1263   :  { %v2409_v60 = vmul.f32 %v4711_v14, %v2389_v30 }
0x1264   :  { %2426 = vrot.lane.b32.xlu0 %v2408_v17, %s3835_s3 }
0x1265   :  { %v2391_v51 = vpop.permute.xlu0 %2390  ;;  %2428 = vrot.lane.b32.xlu1 %v2409_v60, %s3835_s3 }
0x1266   :  { %v2410_v27 = vmul.f32 %v4714_v1, %v2391_v51  ;;  %v2393_v16 = vpop.permute.xlu1 %2392 }
0x1267   :  { %v2411_v3 = vmul.f32 %v4719_v43, %v2393_v16 }
0x1268   :  { %2430 = vrot.lane.b32.xlu0 %v2410_v27, %s3835_s3 }
0x1269   :  { %v2397_v10 = vpop.permute.xlu0 %2396  ;;  %2432 = vrot.lane.b32.xlu1 %v2411_v3, %s3835_s3 }
0x126a   :  { %v2413_v39 = vmul.f32 %v4722_v4, %v2397_v10  ;;  %v2395_v23 = vpop.permute.xlu1 %2394 }
0x126b   :  { %v2412_v59 = vmul.f32 %v4727_v40, %v2395_v23 }
0x126c   :  { %2436 = vrot.lane.b32.xlu0 %v2413_v39, %s3835_s3 }
0x126d   :  { %2434 = vrot.lane.b32.xlu1 %v2412_v59, %s3835_s3 }
0x12d2   :  { %v2423_v55 = vpop.permute.xlu0 %2422 }
0x12d3   :  { %v4734_v50 = vadd.f32 %v2423_v55, %v2366_v32  ;;  %v2425_v35 = vpop.permute.xlu1 %2424 }
0x12d4   :  { %v4742_v21 = vadd.f32 %v2425_v35, %v2367_v37 }
0x12d5   :  { %3720 = vtanh.f32 %v4734_v50 }
0x12d6   :  { %v2427_v42 = vpop.permute.xlu0 %2426  ;;  %3722 = vtanh.f32 %v4742_v21 }
0x12d7   :  { %v4745_v48 = vadd.f32 %v2427_v42, %v2368_v56  ;;  %v2429_v29 = vpop.permute.xlu1 %2428 }
0x12d8   :  { %v4752_v6 = vadd.f32 %v2429_v29, %v2369_v24 }
0x12d9   :  { %3724 = vtanh.f32 %v4745_v48 }
0x12da   :  { %v2431_v7 = vpop.permute.xlu0 %2430  ;;  %3726 = vtanh.f32 %v4752_v6 }
0x12db   :  { %v4756_v57 = vadd.f32 %v2431_v7, %v2370_v63  ;;  %v2433_v31 = vpop.permute.xlu1 %2432 }
0x12dc   :  { %v4763_v20 = vadd.f32 %v2433_v31, %v2371_v22 }
0x12dd   :  { %3728 = vtanh.f32 %v4756_v57 }
0x12de   :  { %v2437_v13 = vpop.permute.xlu0 %2436  ;;  %3730 = vtanh.f32 %v4763_v20 }
0x12df   :  { %v3721_v18 = vpop.eup %3720  ;;  %v4765_v11 = vadd.f32 %v2437_v13, %v2373_v62  ;;  %v2435_v26 = vpop.permute.xlu1 %2434 }
0x12e0   :  { %2470 = vrot.lane.b32.xlu0 %v3721_v18, %s3834_s0  ;;  %v3723_v46 = vpop.eup %3722  ;;  %v4770_v9 = vadd.f32 %v2435_v26, %v2372_v2 }
0x12e1   :  { %3732 = vtanh.f32 %v4765_v11  ;;  %2472 = vrot.lane.b32.xlu1 %v3723_v46, %s3834_s0 }
0x12e2   :  { %3734 = vtanh.f32 %v4770_v9 }
0x12e3   :  { %v3725_v53 = vpop.eup %3724 }
0x12e4   :  { %2474 = vrot.lane.b32.xlu0 %v3725_v53, %s3834_s0  ;;  %v3727_v34 = vpop.eup %3726 }
0x12e5   :  { %2476 = vrot.lane.b32.xlu1 %v3727_v34, %s3834_s0 }
0x12e7   :  { %v3729_v17 = vpop.eup %3728 }
0x12e8   :  { %2478 = vrot.lane.b32.xlu0 %v3729_v17, %s3834_s0  ;;  %v3731_v30 = vpop.eup %3730 }
0x12e9   :  { %2480 = vrot.lane.b32.xlu1 %v3731_v30, %s3834_s0 }
0x12eb   :  { %v3733_v60 = vpop.eup %3732 }
0x12ec   :  { %2484 = vrot.lane.b32.xlu0 %v3733_v60, %s3834_s0  ;;  %v3735_v51 = vpop.eup %3734 }
0x12ed   :  { %2482 = vrot.lane.b32.xlu1 %v3735_v51, %s3834_s0 }
0x1352   :  { %v2471_v27 = vpop.permute.xlu0 %2470 }
0x1353   :  { %v2494_v16 = vmul.f32 %v4700_v58, %v2471_v27  ;;  %v2473_v3 = vpop.permute.xlu1 %2472 }
0x1354   :  { %v2495_v10 = vmul.f32 %v4704_v45, %v2473_v3 }
0x1355   :  { %v2510_v39 = vrot.slane %v2494_v16, 6 }
0x1356   :  { %v2475_v23 = vpop.permute.xlu0 %2474  ;;  %v2511_v54 = vrot.slane %v2495_v10, 5 }
0x1357   :  { %v2496_v59 = vmul.f32 %v4706_v15, %v2475_v23  ;;  %v2477_v32 = vpop.permute.xlu1 %2476 }
0x1358   :  { %v2512_v47 = vsel %vm488_vm2, %v2511_v54, %v2510_v39  ;;  %v2497_v8 = vmul.f32 %v4711_v14, %v2477_v32 }
0x1359   :  { %v2513_v55 = vrot.slane %v2496_v59, 4 }
0x135a   :  { %v2479_v37 = vpop.permute.xlu0 %2478  ;;  %v2515_v58 = vrot.slane %v2497_v8, 3 }
0x135b   :  { %v2514_v35 = vsel %vm491_vm3, %v2513_v55, %v2512_v47  ;;  %v2498_v56 = vmul.f32 %v4714_v1, %v2479_v37  ;;  %v2481_v38 = vpop.permute.xlu1 %2480 }
0x135c   :  { %v2499_v45 = vmul.f32 %v4719_v43, %v2481_v38  ;;  %v2516_v19 = vsel %vm494_vm4, %v2515_v58, %v2514_v35 }
0x135d   :  { %v2517_v42 = vrot.slane %v2498_v56, 2 }
0x135e   :  { %v2485_v15 = vpop.permute.xlu0 %2484  ;;  %v2519_v29 = vrot.slane %v2499_v45, 1 }
0x135f   :  { %v2518_v24 = vsel %vm497_vm5, %v2517_v42, %v2516_v19  ;;  %v2501_v18 = vmul.f32 %v4722_v4, %v2485_v15  ;;  %v2483_v63 = vpop.permute.xlu1 %2482 }
0x1360   :  { %v2500_v61 = vmul.f32 %v4727_v40, %v2483_v63  ;;  %v2520_v7 = vsel %vm500_vm6, %v2519_v29, %v2518_v24 }
0x1361   :  { %v2522_v14 = vrot.slane %v2501_v18, 7 }
0x1362   :  { %v2521_v1 = vsel %vm503_vm7, %v2500_v61, %v2520_v7 }
0x1363   :  { %v2523_v12 = vsel %vm506_vm8, %v2522_v14, %v2521_v1 }
0x1364   :  { %2524 = vrot.lane.b32.xlu0 %v2523_v12, %s3835_s3 }
0x13d6   :  { %v2525_v43 = vpop.permute.xlu0 %2524 }
0x13d7   :  { %3205 = vmatmul.mubr.msk.f32.vlgmr.msra.gmra.mrb[8].mxu1 %vm60_vm1, %v2525_v43 }
0x14aa   :  { %v2594_v22 = vpop.f32.mrb[8].mxu1 }
0x14ab   :  { %v2599_v31 = vrot.slane %v2594_v22, 1  ;;  %v3206_v62 = vpop.f32.mrb[9].mxu1  ;;  %v2600_v5 = vrot.slane %v2594_v22, 2  ;;  %v2601_v13 = vrot.slane %v2594_v22, 3  ;;  %v2602_v40 = vrot.slane %v2594_v22, 4 }
0x14ac   :  { %v2603_v26 = vrot.slane %v2594_v22, 5  ;;  %v2604_v53 = vrot.slane %v2594_v22, 6  ;;  %v2605_v30 = vrot.slane %v2594_v22, 7 }
0x14ad   :  { %v2614_v4 = vadd.f32 %v2599_v31, %v3969_v28  ;;  %v2615_v2 = vadd.f32 %v2600_v5, %v3967_v25  ;;  %v2616_v46 = vadd.f32 %v2601_v13, %v3975_v36  ;;  %v2617_v34 = vadd.f32 %v2602_v40, %v3972_v33 }
0x14ae   :  { %v2618_v60 = vadd.f32 %v2603_v26, %v3981_v44  ;;  %v2619_v28 = vadd.f32 %v2604_v53, %v3978_v41  ;;  %v2620_v51 = vadd.f32 %v2605_v30, %v3987_v52  ;;  %v2621_v25 = vadd.f32 %v2594_v22, %v3984_v49 }
0x14af   :  { %3736 = vtanh.f32 %v2614_v4  ;;  %v3032_v16 = vmul.f32 -1.442695, %v2614_v4  ;;  %v3033_v3 = vmul.f32 -1.442695, %v2615_v2  ;;  %v3034_v10 = vmul.f32 -1.442695, %v2616_v46 }
0x14b0   :  { %3738 = vtanh.f32 %v2615_v2  ;;  %v3035_v39 = vmul.f32 -1.442695, %v2617_v34  ;;  %v3036_v59 = vmul.f32 -1.442695, %v2618_v60  ;;  %v3037_v54 = vmul.f32 -1.442695, %v2619_v28 }
0x14b1   :  { %3740 = vtanh.f32 %v2616_v46  ;;  %v3038_v55 = vmul.f32 -1.442695, %v2620_v51  ;;  %v3039_v47 = vmul.f32 -1.442695, %v2621_v25 }
0x14b2   :  { %3742 = vtanh.f32 %v2617_v34 }
0x14b3   :  { %3744 = vtanh.f32 %v2618_v60 }
0x14b4   :  { %3746 = vtanh.f32 %v2619_v28 }
0x14b5   :  { %3748 = vtanh.f32 %v2620_v51 }
0x14b6   :  { %3750 = vtanh.f32 %v2621_v25 }
0x14b7   :  { %3752 = vpow2.f32 %v3032_v16 }
0x14b8   :  { %3754 = vpow2.f32 %v3033_v3 }
0x14b9   :  { %v3737_v17 = vpop.eup %3736  ;;  %3756 = vpow2.f32 %v3034_v10  ;;  %v2689_v10 = vrot.slane %v4752_v6, 7  ;;  %v2692_v6 = vrot.slane %v4770_v9, 7 }
0x14ba   :  { %2718 = vrot.lane.b32.xlu1 %v3737_v17, %s3834_s0  ;;  %v3739_v36 = vpop.eup %3738  ;;  %3758 = vpow2.f32 %v3035_v39 }
0x14bb   :  { %v3741_v33 = vpop.eup %3740  ;;  %2720 = vrot.lane.b32.xlu0 %v3739_v36, %s3834_s0  ;;  %3760 = vpow2.f32 %v3036_v59  ;;  %v2686_v36 = vrot.slane %v4734_v50, 7  ;;  %v2690_v50 = vrot.slane %v4756_v57, 7 }
0x14bc   :  { %v3743_v44 = vpop.eup %3742  ;;  %3762 = vpow2.f32 %v3037_v54 }
0x14bd   :  { %v3745_v27 = vpop.eup %3744 }
0x14be   :  { %2722 = vrot.lane.b32.xlu1 %v3741_v33, %s3834_s0  ;;  %v3747_v41 = vpop.eup %3746 }
0x14bf   :  { %2724 = vrot.lane.b32.xlu0 %v3743_v44, %s3834_s0  ;;  %v3749_v52 = vpop.eup %3748 }
0x14c0   :  { %v3751_v49 = vpop.eup %3750 }
0x14c1   :  { %v3753_v23 = vpop.eup %3752 }
0x14c2   :  { %2726 = vrot.lane.b32.xlu1 %v3745_v27, %s3834_s0  ;;  %v2646_v32 = vadd.f32 1.0, %v3753_v23  ;;  %v3755_v8 = vpop.eup %3754 }
0x14c3   :  { %2728 = vrot.lane.b32.xlu0 %v3747_v41, %s3834_s0  ;;  %v3757_v37 = vpop.eup %3756  ;;  %v2647_v35 = vadd.f32 1.0, %v3755_v8  ;;  %v2687_v41 = vrot.slane %v4742_v21, 7 }
0x14c4   :  { %3764 = vrcp.f32 %v2646_v32  ;;  %v3759_v56 = vpop.eup %3758  ;;  %v2648_v58 = vadd.f32 1.0, %v3757_v37 }
0x14c5   :  { %3766 = vpow2.f32 %v3038_v55  ;;  %v3761_v38 = vpop.eup %3760  ;;  %v2649_v45 = vadd.f32 1.0, %v3759_v56 }
0x14c6   :  { %2730 = vrot.lane.b32.xlu1 %v3749_v52, %s3834_s0  ;;  %3768 = vpow2.f32 %v3039_v47  ;;  %v3763_v42 = vpop.eup %3762  ;;  %v2650_v24 = vadd.f32 1.0, %v3761_v38  ;;  %v2688_v52 = vrot.slane %v4745_v48, 7  ;;  %v2691_v48 = vrot.slane %v4763_v20, 7 }
0x14c7   :  { %2732 = vrot.lane.b32.xlu0 %v3751_v49, %s3834_s0  ;;  %3770 = vrcp.f32 %v2647_v35  ;;  %v2651_v63 = vadd.f32 1.0, %v3763_v42 }
0x14c8   :  { %3772 = vrcp.f32 %v2648_v58  ;;  %v2693_v58 = vrot.slane %v4765_v11, 7 }
0x14c9   :  { %3774 = vrcp.f32 %v2649_v45 }
0x14ca   :  { %3776 = vrcp.f32 %v2650_v24 }
0x14cb   :  { %3778 = vrcp.f32 %v2651_v63  ;;  %v2839_v63 = vld [vmem:[#allocation2 + $0x8] sm:$0xff] }
0x14ce   :  { %v4813_v19 = vpop.eup %3764 }
0x14cf   :  { %v3767_v18 = vpop.eup %3766  ;;  %v2702_v33 = vmul.f32 %v4813_v19, %v2686_v36 }
0x14d0   :  { %v3769_v14 = vpop.eup %3768  ;;  %v2652_v61 = vadd.f32 1.0, %v3767_v18 }
0x14d1   :  { %v2653_v7 = vadd.f32 1.0, %v3769_v14  ;;  %v4817_v1 = vpop.eup %3770  ;;  %v2840_v14 = vld [vmem:[#allocation2 + $0x10] sm:$0xff] }
0x14d2   :  { %3780 = vrcp.f32 %v2652_v61  ;;  %v4819_v43 = vpop.eup %3772  ;;  %v2703_v49 = vmul.f32 %v4817_v1, %v2687_v41 }
0x14d3   :  { %3782 = vrcp.f32 %v2653_v7  ;;  %v4824_v4 = vpop.eup %3774  ;;  %v2704_v3 = vmul.f32 %v4819_v43, %v2688_v52  ;;  %v2841_v7 = vld [vmem:[#allocation2 + $0x18] sm:$0xff] }
0x14d4   :  { %v4827_v13 = vpop.eup %3776  ;;  %v2705_v54 = vmul.f32 %v4824_v4, %v2689_v10 }
0x14d5   :  { %v4832_v46 = vpop.eup %3778  ;;  %v2706_v21 = vmul.f32 %v4827_v13, %v2690_v50 }
0x14d6   :  { %v2707_v57 = vmul.f32 %v4832_v46, %v2691_v48 }
0x14dc   :  { %v4835_v34 = vpop.eup %3780 }
0x14dd   :  { %v4840_v28 = vpop.eup %3782  ;;  %v2708_v56 = vmul.f32 %v4835_v34, %v2692_v6 }
0x14de   :  { %v2709_v20 = vmul.f32 %v4840_v28, %v2693_v58 }
0x152c   :  { %v2719_v15 = vpop.permute.xlu1 %2718 }
0x152d   :  { %v2742_v29 = vmul.f32 %v4813_v19, %v2719_v15  ;;  %v2721_v12 = vpop.permute.xlu0 %2720 }
0x152e   :  { %v2743_v22 = vmul.f32 %v4817_v1, %v2721_v12 }
0x152f   :  { %2758 = vrot.lane.b32.xlu1 %v2742_v29, %s3835_s3  ;;  %v2838_v29 = vld [vmem:[#allocation2] sm:$0xff] }
0x1530   :  { %v2723_v31 = vpop.permute.xlu1 %2722  ;;  %2760 = vrot.lane.b32.xlu0 %v2743_v22, %s3835_s3  ;;  %v3275_v61 = vpack.c.bf16 %v2839_v63, %v2838_v29  ;;  %v3278_v22 = vpack.c.bf16 %v2841_v7, %v2840_v14 }
0x1531   :  { %v2744_v62 = vmul.f32 %v4819_v43, %v2723_v31  ;;  %v2725_v5 = vpop.permute.xlu0 %2724 }
0x1532   :  { %v2745_v40 = vmul.f32 %v4824_v4, %v2725_v5  ;;  %3276 = vmatpush3.bf16.msra.mxu0 %v3275_v61 }
0x1533   :  { %2762 = vrot.lane.b32.xlu1 %v2744_v62, %s3835_s3  ;;  %3277 = vmatprep.subr.bf16.mxu0 %v3831_v0 }
0x1534   :  { %v2727_v2 = vpop.permute.xlu1 %2726  ;;  %2764 = vrot.lane.b32.xlu0 %v2745_v40, %s3835_s3 }
0x1535   :  { %v2746_v26 = vmul.f32 %v4827_v13, %v2727_v2  ;;  %v2729_v53 = vpop.permute.xlu0 %2728 }
0x1536   :  { %v2747_v17 = vmul.f32 %v4832_v46, %v2729_v53  ;;  %3279 = vmatpush3.bf16.msra.mxu0 %v3278_v22 }
0x1537   :  { %2766 = vrot.lane.b32.xlu1 %v2746_v26, %s3835_s3 }
0x1538   :  { %v2731_v30 = vpop.permute.xlu1 %2730  ;;  %2768 = vrot.lane.b32.xlu0 %v2747_v17, %s3835_s3 }
0x1539   :  { %v2748_v60 = vmul.f32 %v4835_v34, %v2731_v30  ;;  %v2733_v51 = vpop.permute.xlu0 %2732 }
0x153a   :  { %v2749_v25 = vmul.f32 %v4840_v28, %v2733_v51 }
0x153b   :  { %2770 = vrot.lane.b32.xlu1 %v2748_v60, %s3835_s3 }
0x153c   :  { %2772 = vrot.lane.b32.xlu0 %v2749_v25, %s3835_s3 }
0x15a1   :  { %v2759_v44 = vpop.permute.xlu1 %2758 }
0x15a2   :  { %v2782_v27 = vadd.f32 %v2759_v44, %v2702_v33  ;;  %v2761_v16 = vpop.permute.xlu0 %2760 }
0x15a3   :  { %v2783_v39 = vadd.f32 %v2761_v16, %v2703_v49 }
0x15a4   :  { %3784 = vtanh.f32 %v2782_v27 }
0x15a5   :  { %v2763_v23 = vpop.permute.xlu1 %2762  ;;  %3786 = vtanh.f32 %v2783_v39 }
0x15a6   :  { %v2784_v59 = vadd.f32 %v2763_v23, %v2704_v3  ;;  %v2765_v55 = vpop.permute.xlu0 %2764 }
0x15a7   :  { %v2785_v47 = vadd.f32 %v2765_v55, %v2705_v54 }
0x15a8   :  { %3788 = vtanh.f32 %v2784_v59 }
0x15a9   :  { %v2767_v8 = vpop.permute.xlu1 %2766  ;;  %3790 = vtanh.f32 %v2785_v47 }
0x15aa   :  { %v2786_v37 = vadd.f32 %v2767_v8, %v2706_v21  ;;  %v2769_v35 = vpop.permute.xlu0 %2768 }
0x15ab   :  { %v2787_v38 = vadd.f32 %v2769_v35, %v2707_v57 }
0x15ac   :  { %3792 = vtanh.f32 %v2786_v37 }
0x15ad   :  { %v2771_v42 = vpop.permute.xlu1 %2770  ;;  %3794 = vtanh.f32 %v2787_v38 }
0x15ae   :  { %v3785_v32 = vpop.eup %3784  ;;  %v2788_v45 = vadd.f32 %v2771_v42, %v2708_v56  ;;  %v2773_v15 = vpop.permute.xlu0 %2772 }
0x15af   :  { %2806 = vrot.lane.b32.xlu1 %v3785_v32, %s3834_s0  ;;  %v3787_v24 = vpop.eup %3786  ;;  %v2789_v9 = vadd.f32 %v2773_v15, %v2709_v20 }
0x15b0   :  { %3796 = vtanh.f32 %v2788_v45  ;;  %2808 = vrot.lane.b32.xlu0 %v3787_v24, %s3834_s0 }
0x15b1   :  { %3798 = vtanh.f32 %v2789_v9 }
0x15b2   :  { %v3789_v18 = vpop.eup %3788 }
0x15b3   :  { %2810 = vrot.lane.b32.xlu1 %v3789_v18, %s3834_s0  ;;  %v3791_v11 = vpop.eup %3790 }
0x15b4   :  { %2812 = vrot.lane.b32.xlu0 %v3791_v11, %s3834_s0 }
0x15b6   :  { %v3793_v12 = vpop.eup %3792 }
0x15b7   :  { %2814 = vrot.lane.b32.xlu1 %v3793_v12, %s3834_s0  ;;  %v3795_v31 = vpop.eup %3794 }
0x15b8   :  { %2816 = vrot.lane.b32.xlu0 %v3795_v31, %s3834_s0 }
0x15ba   :  { %v3797_v62 = vpop.eup %3796 }
0x15bb   :  { %2818 = vrot.lane.b32.xlu1 %v3797_v62, %s3834_s0  ;;  %v3799_v5 = vpop.eup %3798 }
0x15bc   :  { %2820 = vrot.lane.b32.xlu0 %v3799_v5, %s3834_s0 }
0x1621   :  { %v2807_v40 = vpop.permute.xlu1 %2806 }
0x1622   :  { %v2830_v2 = vmul.f32 %v4813_v19, %v2807_v40  ;;  %v2809_v26 = vpop.permute.xlu0 %2808 }
0x1623   :  { %v2831_v53 = vmul.f32 %v4817_v1, %v2809_v26 }
0x1624   :  { %v2857_v17 = vrot.slane %v2830_v2, 7 }
0x1625   :  { %v2811_v30 = vpop.permute.xlu1 %2810  ;;  %v2858_v60 = vrot.slane %v2831_v53, 6 }
0x1626   :  { %v2832_v0 = vmul.f32 %v4819_v43, %v2811_v30  ;;  %v2813_v51 = vpop.permute.xlu0 %2812 }
0x1627   :  { %v2859_v36 = vsel %vm488_vm2, %v2858_v60, %v2857_v17  ;;  %v2833_v33 = vmul.f32 %v4824_v4, %v2813_v51 }
0x1628   :  { %v2860_v25 = vrot.slane %v2832_v0, 5 }
0x1629   :  { %v2815_v44 = vpop.permute.xlu1 %2814  ;;  %v2862_v19 = vrot.slane %v2833_v33, 4 }
0x162a   :  { %v2861_v27 = vsel %vm491_vm3, %v2860_v25, %v2859_v36  ;;  %v2834_v41 = vmul.f32 %v4827_v13, %v2815_v44  ;;  %v2817_v52 = vpop.permute.xlu0 %2816 }
0x162b   :  { %v2835_v1 = vmul.f32 %v4832_v46, %v2817_v52  ;;  %v2863_v16 = vsel %vm494_vm4, %v2862_v19, %v2861_v27 }
0x162c   :  { %v2864_v49 = vrot.slane %v2834_v41, 3 }
0x162d   :  { %v2819_v43 = vpop.permute.xlu1 %2818  ;;  %v2866_v39 = vrot.slane %v2835_v1, 2 }
0x162e   :  { %v2865_v3 = vsel %vm497_vm5, %v2864_v49, %v2863_v16  ;;  %v2836_v10 = vmul.f32 %v4835_v34, %v2819_v43  ;;  %v2821_v23 = vpop.permute.xlu0 %2820  ;;  %v3040_v34 = vld [vmem:[%s4898_s5] ss:$0 sm:$0xff] }
0x162f   :  { %v2837_v50 = vmul.f32 %v4840_v28, %v2821_v23  ;;  %v2867_v59 = vsel %vm500_vm6, %v2866_v39, %v2865_v3 }
0x1630   :  { %v2868_v4 = vrot.slane %v2836_v10, 1 }
0x1632   :  { %v2869_v13 = vsel %vm503_vm7, %v2868_v4, %v2867_v59 }
0x1633   :  { %v2870_v54 = vsel %vm506_vm8, %v2837_v50, %v2869_v13 }
0x1634   :  { %2871 = vrot.lane.b32.xlu1 %v2870_v54, %s3835_s3 }
0x16a6   :  { %v2872_v46 = vpop.permute.xlu1 %2871 }
0x16a7   :  { %3216 = vmatmul.mubr.msk.f32.vlgmr.msra.gmra.mrb[14].mxu0 %vm60_vm1, %v2872_v46 }
0x177a   :  { %v2941_v32 = vpop.f32.mrb[14].mxu0 }
0x177b   :  { %v2942_v55 = vadd.f32 %v3040_v34, %v2941_v32  ;;  %v3217_v21 = vpop.f32.mrb[15].mxu0 }
0x177d   :  { %2945 = vmax.xlane.f32.xlu0 %v2942_v55 }
0x180a   :  { %v2946_v28 = vpop.xlane.xlu0 %2945 }
0x180b   :  { %v2947_v48 = vsub.f32 %v2942_v55, %v2946_v28 }
0x180d   :  { %v2948_v47 = vmul.f32 1.442695, %v2947_v48 }
0x180f   :  { %3800 = vpow2.f32 %v2948_v47 }
0x1819   :  { %v3801_v8 = vpop.eup %3800 }
0x181a   :  { %2950 = vadd.xlane.f32.xlu1 %v3801_v8 }
0x18a7   :  { %v2951_v6 = vpop.xlane.xlu1 %2950 }
0x18a8   :  { %3802 = vrcp.f32 %v2951_v6 }
0x18b2   :  { %v3803_v37 = vpop.eup %3802 }
0x18b3   :  { %v2953_v57 = vmul.f32 %v3803_v37, %v3801_v8 }
0x18b5   :  { %2954 = vst [vmem:[%s4899_s6] sm:$0xff] %v2953_v57 }
0x18b6   :  { %2959 = vsyncpa [#allocation3], 1 }

</bundles_post_ra>
